<compile_context>
chip_gen: v6e
topology: v6e:2x2x1
jax: 0.10.0
libtpu: 0.0.40
codegen_flags: <defaults>
</compile_context>

<pallas_src>
import functools

import jax
import jax.numpy as jnp
from jax.experimental import pallas as pl
from jax.experimental.pallas import tpu as pltpu

LANE = 128
SUBLANE = 8
H1, H2, H3 = 684, 512, 256   # original hidden widths (H1 gets padded to 768)


def _round_up(n, m):
    return ((n + m - 1) // m) * m


# ---------------------------------------------------------------------------
# Kernel: one batch tile through the whole MLP.
# x tile is bf16; weights bf16; biases f32; matmuls accumulate in f32.
# ---------------------------------------------------------------------------
def _decoder_kernel(x_ref,
                    w1_ref, b1_ref,
                    w2_ref, b2_ref,
                    w3_ref, b3_ref,
                    w4_ref, b4_ref,
                    o_ref):
    # Layer 1: (TB, Lp) @ (Lp, 768) -> ReLU
    h = jnp.dot(x_ref[...], w1_ref[...], preferred_element_type=jnp.float32)
    h = jnp.maximum(h + b1_ref[...], 0.0).astype(jnp.bfloat16)

    # Layer 2: (TB, 768) @ (768, 512) -> ReLU
    h = jnp.dot(h, w2_ref[...], preferred_element_type=jnp.float32)
    h = jnp.maximum(h + b2_ref[...], 0.0).astype(jnp.bfloat16)

    # Layer 3: (TB, 512) @ (512, 256) -> ReLU
    h = jnp.dot(h, w3_ref[...], preferred_element_type=jnp.float32)
    h = jnp.maximum(h + b3_ref[...], 0.0).astype(jnp.bfloat16)

    # Layer 4: (TB, 256) @ (256, out_pad) -> tanh (lane-dense f32 store)
    h = jnp.dot(h, w4_ref[...], preferred_element_type=jnp.float32)
    o_ref[...] = jnp.tanh(h + b4_ref[...])


# ---------------------------------------------------------------------------
# Parameter construction / preparation
# ---------------------------------------------------------------------------
def init_decoder_params(key, latent_dim, output_dim):
    """Deterministic synthetic params matching nn.Linear shapes, stored (in, out)."""
    dims = [(latent_dim, H1), (H1, H2), (H2, H3), (H3, output_dim)]
    params = {}
    for i, (fan_in, fan_out) in enumerate(dims, start=1):
        key, kw, kb = jax.random.split(key, 3)
        bound = 1.0 / jnp.sqrt(fan_in)  # same init range as torch nn.Linear
        params[f"w{i}"] = jax.random.uniform(
            kw, (fan_in, fan_out), jnp.float32, -bound, bound)
        params[f"b{i}"] = jax.random.uniform(
            kb, (1, fan_out), jnp.float32, -bound, bound)
    return params


def prepare_decoder_params(params, latent_dim, output_dim):
    """One-time padding to lane-multiples + bf16 cast of the weights.

    Zero-padding is exact: padded input columns see zero weights, padded
    hidden columns carry zero bias and zero weights into the next layer,
    padded output columns are sliced off by the wrapper.
    """
    lat_p = _round_up(latent_dim, LANE)
    h1_p = _round_up(H1, LANE)               # 684 -> 768
    out_p = _round_up(output_dim, LANE)

    def pad2(a, rows, cols):
        return jnp.pad(a, ((0, rows - a.shape[0]), (0, cols - a.shape[1])))

    return {
        "w1": pad2(params["w1"], lat_p, h1_p).astype(jnp.bfloat16),
        "b1": pad2(params["b1"], 1, h1_p),
        "w2": pad2(params["w2"], h1_p, H2).astype(jnp.bfloat16),
        "b2": params["b2"],
        "w3": params["w3"].astype(jnp.bfloat16),
        "b3": params["b3"],
        "w4": pad2(params["w4"], H3, out_p).astype(jnp.bfloat16),
        "b4": pad2(params["b4"], 1, out_p),
    }


# ---------------------------------------------------------------------------
# Forward wrapper
# ---------------------------------------------------------------------------
def decoder_forward(x, pparams, output_dim):
    """x: (B, latent_dim) f32. pparams: output of prepare_decoder_params."""
    B, latent = x.shape
    lat_p = pparams["w1"].shape[0]
    out_p = pparams["w4"].shape[1]

    # Batch tile: multiple of 8 sublanes; cap at 256 rows (fills the MXU on
    # v6e/v7x, stays well inside default scoped VMEM on all generations).
    TB = min(256, _round_up(B, SUBLANE))
    B_pad = _round_up(B, TB)

    xp = jnp.pad(x, ((0, B_pad - B), (0, lat_p - latent))).astype(jnp.bfloat16)

    const = lambda i: (0, 0)   # weights/biases resident across grid steps
    batched = lambda i: (i, 0)

    in_specs = [
        pl.BlockSpec((TB, lat_p), batched),                 # x tile
        pl.BlockSpec(pparams["w1"].shape, const),
        pl.BlockSpec(pparams["b1"].shape, const),
        pl.BlockSpec(pparams["w2"].shape, const),
        pl.BlockSpec(pparams["b2"].shape, const),
        pl.BlockSpec(pparams["w3"].shape, const),
        pl.BlockSpec(pparams["b3"].shape, const),
        pl.BlockSpec(pparams["w4"].shape, const),
        pl.BlockSpec(pparams["b4"].shape, const),
    ]

    out = pl.pallas_call(
        _decoder_kernel,
        grid=(B_pad // TB,),
        out_shape=jax.ShapeDtypeStruct((B_pad, out_p), jnp.float32),
        in_specs=in_specs,
        out_specs=pl.BlockSpec((TB, out_p), batched),
        compiler_params=pltpu.CompilerParams(
            dimension_semantics=("parallel",)),
    )(xp,
      pparams["w1"], pparams["b1"],
      pparams["w2"], pparams["b2"],
      pparams["w3"], pparams["b3"],
      pparams["w4"], pparams["b4"])

    return out[:B, :output_dim]


def decoder_reference(x, params):
    """Pure-JAX f32 reference for sanity checking."""
    h = jnp.maximum(x @ params["w1"] + params["b1"], 0.0)
    h = jnp.maximum(h @ params["w2"] + params["b2"], 0.0)
    h = jnp.maximum(h @ params["w3"] + params["b3"], 0.0)
    return jnp.tanh(h @ params["w4"] + params["b4"])


if __name__ == "__main__":
    latent_dim = 32
    output_dim = 64
    batch = 8          # NOTE: at B=8 this kernel is overhead-bound; it scales
                       # to large B via the batch grid without code changes.

    key = jax.random.PRNGKey(0)
    key, kx = jax.random.split(key)
    params = init_decoder_params(key, latent_dim, output_dim)
    pparams = prepare_decoder_params(params, latent_dim, output_dim)
    x = jax.random.normal(kx, (batch, latent_dim), jnp.float32)

    fwd = jax.jit(functools.partial(decoder_forward, output_dim=output_dim))
    out = jax.block_until_ready(fwd(x, pparams))

    ref = decoder_reference(x, params)
    assert out.shape == (batch, output_dim), out.shape
    # bf16 MXU operands -> relaxed tolerance vs the f32 reference.
    assert jnp.allclose(out, ref, atol=3e-2, rtol=3e-2), (
        float(jnp.max(jnp.abs(out - ref))))

    print("KERNEL_OK")
</pallas_src>

<mosaic_0001>
module attributes {stable_mosaic.version = 11 : i64} {
  func.func @_decoder_kernel(%arg0: i32, %arg1: memref<8x128xbf16, #tpu.memory_space<vmem>>, %arg2: memref<128x768xbf16, #tpu.memory_space<vmem>>, %arg3: memref<1x768xf32, #tpu.memory_space<vmem>>, %arg4: memref<768x512xbf16, #tpu.memory_space<vmem>>, %arg5: memref<1x512xf32, #tpu.memory_space<vmem>>, %arg6: memref<512x256xbf16, #tpu.memory_space<vmem>>, %arg7: memref<1x256xf32, #tpu.memory_space<vmem>>, %arg8: memref<256x128xbf16, #tpu.memory_space<vmem>>, %arg9: memref<1x128xf32, #tpu.memory_space<vmem>>, %arg10: memref<8x128xf32, #tpu.memory_space<vmem>>) attributes {dimension_semantics = [#tpu.dimension_semantics<parallel>], iteration_bounds = array<i64: 1>, scalar_prefetch = 0 : i64, scratch_operands = 0 : i64, tpu.core_type = #tpu.core_type<tc>, window_params = [{transform_indices = @transform_0, window_bounds = array<i64: 8, 128>}, {pipeline_mode = #tpu.pipeline_mode<synchronous>, transform_indices = @transform_1, window_bounds = array<i64: 128, 768>}, {pipeline_mode = #tpu.pipeline_mode<synchronous>, transform_indices = @transform_2, window_bounds = array<i64: 1, 768>}, {pipeline_mode = #tpu.pipeline_mode<synchronous>, transform_indices = @transform_3, window_bounds = array<i64: 768, 512>}, {pipeline_mode = #tpu.pipeline_mode<synchronous>, transform_indices = @transform_4, window_bounds = array<i64: 1, 512>}, {pipeline_mode = #tpu.pipeline_mode<synchronous>, transform_indices = @transform_5, window_bounds = array<i64: 512, 256>}, {pipeline_mode = #tpu.pipeline_mode<synchronous>, transform_indices = @transform_6, window_bounds = array<i64: 1, 256>}, {pipeline_mode = #tpu.pipeline_mode<synchronous>, transform_indices = @transform_7, window_bounds = array<i64: 256, 128>}, {pipeline_mode = #tpu.pipeline_mode<synchronous>, transform_indices = @transform_8, window_bounds = array<i64: 1, 128>}, {transform_indices = @transform_9, window_bounds = array<i64: 8, 128>}]} {
    %c0 = arith.constant 0 : index
    %c0_0 = arith.constant 0 : index
    %0 = vector.load %arg1[%c0, %c0_0] : memref<8x128xbf16, #tpu.memory_space<vmem>>, vector<8x128xbf16>
    %c0_1 = arith.constant 0 : index
    %c0_2 = arith.constant 0 : index
    %1 = vector.load %arg2[%c0_1, %c0_2] : memref<128x768xbf16, #tpu.memory_space<vmem>>, vector<128x768xbf16>
    %cst = arith.constant dense<0.000000e+00> : vector<8x768xf32>
    %2 = tpu.matmul %0, %1, %cst {dimension_numbers = #tpu.dot_dimension_numbers<[1], [0], [0], [1], [0, 0, 1, 1], [], []>} : vector<8x128xbf16>, vector<128x768xbf16>, vector<8x768xf32> -> vector<8x768xf32>
    %c0_3 = arith.constant 0 : index
    %c0_4 = arith.constant 0 : index
    %3 = vector.load %arg3[%c0_3, %c0_4] : memref<1x768xf32, #tpu.memory_space<vmem>>, vector<1x768xf32>
    %4 = vector.broadcast %3 : vector<1x768xf32> to vector<8x768xf32>
    %5 = arith.addf %2, %4 : vector<8x768xf32>
    %cst_5 = arith.constant 0.000000e+00 : f32
    %6 = vector.broadcast %cst_5 : f32 to vector<8x768xf32>
    %7 = arith.maximumf %5, %6 : vector<8x768xf32>
    %8 = arith.truncf %7 : vector<8x768xf32> to vector<8x768xbf16>
    %c0_6 = arith.constant 0 : index
    %c0_7 = arith.constant 0 : index
    %9 = vector.load %arg4[%c0_6, %c0_7] : memref<768x512xbf16, #tpu.memory_space<vmem>>, vector<768x512xbf16>
    %cst_8 = arith.constant dense<0.000000e+00> : vector<8x512xf32>
    %10 = tpu.matmul %8, %9, %cst_8 {dimension_numbers = #tpu.dot_dimension_numbers<[1], [0], [0], [1], [0, 0, 1, 1], [], []>} : vector<8x768xbf16>, vector<768x512xbf16>, vector<8x512xf32> -> vector<8x512xf32>
    %c0_9 = arith.constant 0 : index
    %c0_10 = arith.constant 0 : index
    %11 = vector.load %arg5[%c0_9, %c0_10] : memref<1x512xf32, #tpu.memory_space<vmem>>, vector<1x512xf32>
    %12 = vector.broadcast %11 : vector<1x512xf32> to vector<8x512xf32>
    %13 = arith.addf %10, %12 : vector<8x512xf32>
    %cst_11 = arith.constant 0.000000e+00 : f32
    %14 = vector.broadcast %cst_11 : f32 to vector<8x512xf32>
    %15 = arith.maximumf %13, %14 : vector<8x512xf32>
    %16 = arith.truncf %15 : vector<8x512xf32> to vector<8x512xbf16>
    %c0_12 = arith.constant 0 : index
    %c0_13 = arith.constant 0 : index
    %17 = vector.load %arg6[%c0_12, %c0_13] : memref<512x256xbf16, #tpu.memory_space<vmem>>, vector<512x256xbf16>
    %cst_14 = arith.constant dense<0.000000e+00> : vector<8x256xf32>
    %18 = tpu.matmul %16, %17, %cst_14 {dimension_numbers = #tpu.dot_dimension_numbers<[1], [0], [0], [1], [0, 0, 1, 1], [], []>} : vector<8x512xbf16>, vector<512x256xbf16>, vector<8x256xf32> -> vector<8x256xf32>
    %c0_15 = arith.constant 0 : index
    %c0_16 = arith.constant 0 : index
    %19 = vector.load %arg7[%c0_15, %c0_16] : memref<1x256xf32, #tpu.memory_space<vmem>>, vector<1x256xf32>
    %20 = vector.broadcast %19 : vector<1x256xf32> to vector<8x256xf32>
    %21 = arith.addf %18, %20 : vector<8x256xf32>
    %cst_17 = arith.constant 0.000000e+00 : f32
    %22 = vector.broadcast %cst_17 : f32 to vector<8x256xf32>
    %23 = arith.maximumf %21, %22 : vector<8x256xf32>
    %24 = arith.truncf %23 : vector<8x256xf32> to vector<8x256xbf16>
    %c0_18 = arith.constant 0 : index
    %c0_19 = arith.constant 0 : index
    %25 = vector.load %arg8[%c0_18, %c0_19] : memref<256x128xbf16, #tpu.memory_space<vmem>>, vector<256x128xbf16>
    %cst_20 = arith.constant dense<0.000000e+00> : vector<8x128xf32>
    %26 = tpu.matmul %24, %25, %cst_20 {dimension_numbers = #tpu.dot_dimension_numbers<[1], [0], [0], [1], [0, 0, 1, 1], [], []>} : vector<8x256xbf16>, vector<256x128xbf16>, vector<8x128xf32> -> vector<8x128xf32>
    %c0_21 = arith.constant 0 : index
    %c0_22 = arith.constant 0 : index
    %27 = vector.load %arg9[%c0_21, %c0_22] : memref<1x128xf32, #tpu.memory_space<vmem>>, vector<1x128xf32>
    %28 = vector.broadcast %27 : vector<1x128xf32> to vector<8x128xf32>
    %29 = arith.addf %26, %28 : vector<8x128xf32>
    %30 = math.tanh %29 : vector<8x128xf32>
    %c0_23 = arith.constant 0 : index
    %c0_24 = arith.constant 0 : index
    %31 = vector.load %arg10[%c0_23, %c0_24] : memref<8x128xf32, #tpu.memory_space<vmem>>, vector<8x128xf32>
    tpu.vector_store %arg10[%c0_23, %c0_24], %30 {strides = array<i32>} : memref<8x128xf32, #tpu.memory_space<vmem>>, vector<8x128xf32>,
    return
  }
  func.func @transform_0(%arg0: i32) -> (i32, i32) {
    %c0_i32 = arith.constant 0 : i32
    %c0_i32_0 = arith.constant 0 : i32
    return %arg0, %c0_i32 : i32, i32
  }
  func.func @transform_1(%arg0: i32) -> (i32, i32) {
    %c0_i32 = arith.constant 0 : i32
    %c0_i32_0 = arith.constant 0 : i32
    %c0_i32_1 = arith.constant 0 : i32
    return %c0_i32, %c0_i32_0 : i32, i32
  }
  func.func @transform_2(%arg0: i32) -> (i32, i32) {
    %c0_i32 = arith.constant 0 : i32
    %c0_i32_0 = arith.constant 0 : i32
    %c0_i32_1 = arith.constant 0 : i32
    return %c0_i32, %c0_i32_0 : i32, i32
  }
  func.func @transform_3(%arg0: i32) -> (i32, i32) {
    %c0_i32 = arith.constant 0 : i32
    %c0_i32_0 = arith.constant 0 : i32
    %c0_i32_1 = arith.constant 0 : i32
    return %c0_i32, %c0_i32_0 : i32, i32
  }
  func.func @transform_4(%arg0: i32) -> (i32, i32) {
    %c0_i32 = arith.constant 0 : i32
    %c0_i32_0 = arith.constant 0 : i32
    %c0_i32_1 = arith.constant 0 : i32
    return %c0_i32, %c0_i32_0 : i32, i32
  }
  func.func @transform_5(%arg0: i32) -> (i32, i32) {
    %c0_i32 = arith.constant 0 : i32
    %c0_i32_0 = arith.constant 0 : i32
    %c0_i32_1 = arith.constant 0 : i32
    return %c0_i32, %c0_i32_0 : i32, i32
  }
  func.func @transform_6(%arg0: i32) -> (i32, i32) {
    %c0_i32 = arith.constant 0 : i32
    %c0_i32_0 = arith.constant 0 : i32
    %c0_i32_1 = arith.constant 0 : i32
    return %c0_i32, %c0_i32_0 : i32, i32
  }
  func.func @transform_7(%arg0: i32) -> (i32, i32) {
    %c0_i32 = arith.constant 0 : i32
    %c0_i32_0 = arith.constant 0 : i32
    %c0_i32_1 = arith.constant 0 : i32
    return %c0_i32, %c0_i32_0 : i32, i32
  }
  func.func @transform_8(%arg0: i32) -> (i32, i32) {
    %c0_i32 = arith.constant 0 : i32
    %c0_i32_0 = arith.constant 0 : i32
    %c0_i32_1 = arith.constant 0 : i32
    return %c0_i32, %c0_i32_0 : i32, i32
  }
  func.func @transform_9(%arg0: i32) -> (i32, i32) {
    %c0_i32 = arith.constant 0 : i32
    %c0_i32_0 = arith.constant 0 : i32
    return %arg0, %c0_i32 : i32, i32
  }
}

</mosaic_0001>

<bundles_post_ra>
// kernel: decoder_forward.1
= control target key start
LH: loop header
LB: loop body
LE: loop exit
PB: predicated region body
PF: predicated region fallthrough
CT: control target
= control target key end

     0   :  { %14 = vsyncpa [#allocation3], 0  ;;  %s3747_s0 = inlined_call_operand.vmem [shape: bf16[8,128], index: 0, kind: input, shape index: {}]   ;;  %s3748_s1 = inlined_call_operand.hbm [shape: bf16[128,768], index: 1, kind: input, shape index: {}]   ;;  %s3749_s2 = inlined_call_operand.vmem [shape: f32[1,768], index: 2, kind: input, shape index: {}]   ;;  %s3750_s3 = inlined_call_operand.hbm [shape: bf16[768,512], index: 3, kind: input, shape index: {}]   ;;  %s3751_s4 = inlined_call_operand.vmem [shape: f32[1,512], index: 4, kind: input, shape index: {}]   ;;  %s3752_s5 = inlined_call_operand.hbm [shape: bf16[512,256], index: 5, kind: input, shape index: {}]   ;;  %s3753_s6 = inlined_call_operand.vmem [shape: f32[1,256], index: 6, kind: input, shape index: {}]   ;;  %s3754_s7 = inlined_call_operand.hbm [shape: bf16[256,128], index: 7, kind: input, shape index: {}]   ;;  %s3755_s8 = inlined_call_operand.vmem [shape: f32[1,128], index: 8, kind: input, shape index: {}]   ;;  %s3756_s9 = inlined_call_operand.hbm [shape: f32[8,128], index: 9, kind: output, shape index: {}]  }
   0x1   :  { %15 = vsyncpa [#allocation6], 0 }
   0x2   :  { %16 = vsyncpa [#allocation9], 0 }
   0x3   :  { %17 = vsyncpa [#allocation4], 0  ;;  %s3588_s30 = smov [#allocation5]  }
   0x4   :  { %s39_s10 = sshll.u32 %s3588_s30, 4  ;;  %s40_s10 = int_to_ptr.vmem [resolvable:$true] %s39_s10 }
   0x5   :  { %s3488_s11 = scalar_lea.vmem %s40_s10, 24576  ;;  %p3493_p1 = scmp.lt.s32.totalorder %s40_s10, %s40_s10 }
   0x6   :  { %p3489_p0 = scmp.ne.s32.totalorder %s40_s10, %s3488_s11  ;;  %p3494_p2 = scmp.lt.s32.totalorder %s3488_s11, %s3488_s11 }
   0x8   :  { %p3495_p3 = por %p3494_p2, %p3493_p1 }
   0xa   :  { %p3496_p4 = pnand %p3495_p3, %p3489_p0 }
   0xc   :  { %3499 = shalt.err (!%p3496_p4)
}
   0xd   :  { %s3589_s12 = smov 256   ;;  %s3590_s13 = smov 16  }
   0xe   :  { %45 = dma.hbm_to_vmem [thread:$0]  %s3750_s3, 24576, %s40_s10, [#allocation6], %s3589_s12, %s3589_s12, %s3590_s13  }
   0xf   :  { %s3591_s16 = smov [#allocation2]  }
  0x10   :  { %s25_s17 = sshll.u32 %s3591_s16, 4  ;;  %s26_s17 = int_to_ptr.vmem [resolvable:$true] %s25_s17 }
  0x11   :  { %s3508_s18 = scalar_lea.vmem %s26_s17, 6144  ;;  %p3513_p6 = scmp.lt.s32.totalorder %s26_s17, %s26_s17 }
  0x12   :  { %p3509_p5 = scmp.ne.s32.totalorder %s26_s17, %s3508_s18  ;;  %p3514_p7 = scmp.lt.s32.totalorder %s3508_s18, %s3508_s18 }
  0x14   :  { %p3515_p8 = por %p3514_p7, %p3513_p6 }
  0x16   :  { %p3516_p9 = pnand %p3515_p8, %p3509_p5 }
  0x18   :  { %3519 = shalt.err (!%p3516_p9)
}
  0x19   :  { %s3592_s19 = smov 384   ;;  %s3593_s20 = smov 24  }
  0x1a   :  { %31 = dma.hbm_to_vmem [thread:$0]  %s3748_s1, 6144, %s26_s17, [#allocation3], %s3592_s19, %s3592_s19, %s3593_s20  }
  0x1b   :  { %s3594_s23 = smov [#allocation7]  }
  0x1c   :  { %s53_s24 = sshll.u32 %s3594_s23, 4  ;;  %s54_s24 = int_to_ptr.vmem [resolvable:$true] %s53_s24 }
  0x1d   :  { %s3528_s3 = scalar_lea.vmem %s54_s24, 8192  ;;  %p3533_p11 = scmp.lt.s32.totalorder %s54_s24, %s54_s24 }
  0x1e   :  { %p3529_p10 = scmp.ne.s32.totalorder %s54_s24, %s3528_s3  ;;  %p3534_p12 = scmp.lt.s32.totalorder %s3528_s3, %s3528_s3 }
  0x20   :  { %p3535_p13 = por %p3534_p12, %p3533_p11 }
  0x22   :  { %p3536_p0 = pnand %p3535_p13, %p3529_p10 }
  0x24   :  { %3539 = shalt.err (!%p3536_p0)
}
  0x25   :  { %s3595_s25 = smov 128   ;;  %s3596_s26 = smov 8  }
  0x26   :  { %59 = dma.hbm_to_vmem [thread:$0]  %s3752_s5, 8192, %s54_s24, [#allocation6], %s3595_s25, %s3595_s25, %s3596_s26  }
  0x27   :  { %s3597_s29 = smov [#allocation8]  }
  0x28   :  { %s67_s30 = sshll.u32 %s3597_s29, 4  ;;  %s68_s30 = int_to_ptr.vmem [resolvable:$true] %s67_s30 }
  0x29   :  { %s3548_s1 = scalar_lea.vmem %s68_s30, 2048  ;;  %p3553_p2 = scmp.lt.s32.totalorder %s68_s30, %s68_s30 }
  0x2a   :  { %p3549_p1 = scmp.ne.s32.totalorder %s68_s30, %s3548_s1  ;;  %p3554_p3 = scmp.lt.s32.totalorder %s3548_s1, %s3548_s1 }
  0x2c   :  { %p3555_p4 = por %p3554_p3, %p3553_p2 }
  0x2e   :  { %p3556_p5 = pnand %p3555_p4, %p3549_p1 }
  0x30   :  { %3559 = shalt.err (!%p3556_p5)
}
  0x31   :  { %s3598_s10 = smov 64   ;;  %s3599_s11 = smov 4  }
  0x32   :  { %73 = dma.hbm_to_vmem [thread:$0]  %s3754_s7, 2048, %s68_s30, [#allocation9], %s3598_s10, %s3598_s10, %s3599_s11  }
  0x33   :  { %3580 = dma.done.wait [#allocation3], 6144  }
  0x34   :  { %3581 = vsyncadd [#allocation3], 4294961152 }
  0x35   :  { %3582 = dma.done.wait [#allocation6], 32768  }
  0x36   :  { %3583 = vsyncadd [#allocation6], 4294934528 }
  0x37   :  { %3584 = dma.done.wait [#allocation9], 2048  }
  0x38   :  { %3585 = vsyncadd [#allocation9], 4294965248  ;;  %v3600_v0 = vmov 0   ;;  %v3006_v1 = vld [vmem:[#allocation2 + $0x154] ss:$24 sps:$4 sm:$0xff]   ;;  %s3601_s18 = smov [#allocation10]  }
  0x39   :  { %442 = vmatprep.mubr.bf16.mxu0 %v3600_v0  ;;  %483 = vmatprep.mubr.bf16.mxu1 %v3600_v0  ;;  %v3008_v2 = vld [vmem:[#allocation2 + $0x15c] ss:$24 sps:$4 sm:$0xff]   ;;  %v3010_v3 = vld [vmem:[#allocation2 + $0x150] ss:$24 sps:$4 sm:$0xff]   ;;  %v3014_v6 = vld [vmem:[#allocation2 + $0x12c] ss:$24 sps:$4 sm:$0xff]  }
  0x3a   :  { %410 = vmatprep.subr.bf16.mxu0 %v3006_v1  ;;  %v3011_v4 = vld [vmem:[#allocation2 + $0x158] ss:$24 sps:$4 sm:$0xff]   ;;  %451 = vmatprep.subr.bf16.mxu1 %v3008_v2  ;;  %v3012_v5 = vld [vmem:[#allocation2 + $0x124] ss:$24 sps:$4 sm:$0xff]   ;;  %v3017_v8 = vld [vmem:[#allocation2 + $0x128] ss:$24 sps:$4 sm:$0xff]  }
  0x3b   :  { %411 = vmatpush1.bf16.msra.mxu0 %v3010_v3  ;;  %452 = vmatpush1.bf16.msra.mxu1 %v3011_v4  ;;  %v3016_v7 = vld [vmem:[#allocation2 + $0x120] ss:$24 sps:$4 sm:$0xff]   ;;  %v3018_v9 = vld [vmem:[#allocation2 + $0xf4] ss:$24 sps:$4 sm:$0xff]   ;;  %v3022_v11 = vld [vmem:[#allocation2 + $0xf0] ss:$24 sps:$4 sm:$0xff]  }
  0x3c   :  { %412 = vmatprep.subr.bf16.mxu0 %v3012_v5  ;;  %453 = vmatprep.subr.bf16.mxu1 %v3014_v6  ;;  %v3020_v10 = vld [vmem:[#allocation2 + $0xfc] ss:$24 sps:$4 sm:$0xff]   ;;  %v3023_v12 = vld [vmem:[#allocation2 + $0xf8] ss:$24 sps:$4 sm:$0xff]   ;;  %v3026_v14 = vld [vmem:[#allocation2 + $0xcc] ss:$24 sps:$4 sm:$0xff]  }
  0x3d   :  { %v3024_v13 = vld [vmem:[#allocation2 + $0xc4] ss:$24 sps:$4 sm:$0xff]   ;;  %v3028_v15 = vld [vmem:[#allocation2 + $0xc0] ss:$24 sps:$4 sm:$0xff]   ;;  %v3030_v17 = vld [vmem:[#allocation2 + $0x94] ss:$24 sps:$4 sm:$0xff]  }
  0x3e   :  { %v3029_v16 = vld [vmem:[#allocation2 + $0xc8] ss:$24 sps:$4 sm:$0xff]   ;;  %v3032_v18 = vld [vmem:[#allocation2 + $0x9c] ss:$24 sps:$4 sm:$0xff]   ;;  %v3035_v20 = vld [vmem:[#allocation2 + $0x98] ss:$24 sps:$4 sm:$0xff]  }
  0x3f   :  { %413 = vmatpush1.bf16.msra.mxu0 %v3016_v7  ;;  %454 = vmatpush1.bf16.msra.mxu1 %v3017_v8  ;;  %v3034_v19 = vld [vmem:[#allocation2 + $0x90] ss:$24 sps:$4 sm:$0xff]   ;;  %v3036_v21 = vld [vmem:[#allocation2 + $0x64] ss:$24 sps:$4 sm:$0xff]   ;;  %v3040_v23 = vld [vmem:[#allocation2 + $0x60] ss:$24 sps:$4 sm:$0xff]  }
  0x40   :  { %414 = vmatprep.subr.bf16.mxu0 %v3018_v9  ;;  %455 = vmatprep.subr.bf16.mxu1 %v3020_v10  ;;  %v3038_v22 = vld [vmem:[#allocation2 + $0x6c] ss:$24 sps:$4 sm:$0xff]   ;;  %v3041_v24 = vld [vmem:[#allocation2 + $0x68] ss:$24 sps:$4 sm:$0xff]   ;;  %v3044_v26 = vld [vmem:[#allocation2 + $0x3c] ss:$24 sps:$4 sm:$0xff]  }
  0x41   :  { %v3042_v25 = vld [vmem:[#allocation2 + $0x34] ss:$24 sps:$4 sm:$0xff]   ;;  %v3046_v27 = vld [vmem:[#allocation2 + $0x30] ss:$24 sps:$4 sm:$0xff]   ;;  %v3048_v29 = vld [vmem:[#allocation2 + $0x4] ss:$24 sps:$4 sm:$0xff]  }
  0x42   :  { %v3047_v28 = vld [vmem:[#allocation2 + $0x38] ss:$24 sps:$4 sm:$0xff]   ;;  %v3050_v30 = vld [vmem:[#allocation2 + $0xc] ss:$24 sps:$4 sm:$0xff]   ;;  %v3053_v32 = vld [vmem:[#allocation2 + $0x8] ss:$24 sps:$4 sm:$0xff]  }
  0x43   :  { %415 = vmatpush1.bf16.msra.mxu0 %v3022_v11  ;;  %456 = vmatpush1.bf16.msra.mxu1 %v3023_v12  ;;  %v3052_v31 = vld [vmem:[#allocation2] ss:$24 sps:$4 sm:$0xff]   ;;  %v3056_v33 = vld [vmem:[#allocation2 + $0x164] ss:$24 sps:$4 sm:$0xff]   ;;  %v3059_v36 = vld [vmem:[#allocation2 + $0x134] ss:$24 sps:$4 sm:$0xff]  }
  0x44   :  { %416 = vmatprep.subr.bf16.mxu0 %v3024_v13  ;;  %457 = vmatprep.subr.bf16.mxu1 %v3026_v14  ;;  %v3669_v34 = vld [vmem:[%s3747_s0] sm:$0xf]  ;;  %v3080_v37 = vld [vmem:[#allocation5 + $0xe4] ss:$16 sps:$4 sm:$0xff]   ;;  %v3057_v39 = vld [vmem:[#allocation2 + $0x130] ss:$24 sps:$4 sm:$0xff]  }
  0x45   :  { %v3054_v35 = vld [vmem:[#allocation2 + $0x160] ss:$24 sps:$4 sm:$0xff]   ;;  %v3086_v40 = vld [vmem:[#allocation5 + $0xc4] ss:$16 sps:$4 sm:$0xff]   ;;  %v3063_v48 = vld [vmem:[#allocation2 + $0xd0] ss:$24 sps:$4 sm:$0xff]  }
  0x46   :  { %v3078_v38 = vld [vmem:[#allocation5 + $0xe0] ss:$16 sps:$4 sm:$0xff]   ;;  %v3062_v41 = vld [vmem:[#allocation2 + $0x104] ss:$24 sps:$4 sm:$0xff]   ;;  %v3065_v45 = vld [vmem:[#allocation2 + $0xd4] ss:$24 sps:$4 sm:$0xff]  }
  0x47   :  { %417 = vmatpush1.bf16.msra.mxu0 %v3028_v15  ;;  %458 = vmatpush1.bf16.msra.mxu1 %v3029_v16  ;;  %v3084_v42 = vld [vmem:[#allocation5 + $0xc0] ss:$16 sps:$4 sm:$0xff]   ;;  %v3092_v43 = vld [vmem:[#allocation5 + $0xa4] ss:$16 sps:$4 sm:$0xff]   ;;  %s2638_s19 = sshll.u32 %s3601_s18, 4  ;;  %s2639_s19 = int_to_ptr.vmem [resolvable:$true] %s2638_s19 }
  0x48   :  { %418 = vmatprep.subr.bf16.mxu0 %v3030_v17  ;;  %459 = vmatprep.subr.bf16.mxu1 %v3032_v18  ;;  %v3060_v44 = vld [vmem:[#allocation2 + $0x100] ss:$24 sps:$4 sm:$0xff]   ;;  %v3098_v47 = vld [vmem:[#allocation5 + $0x84] ss:$16 sps:$4 sm:$0xff]   ;;  %v3069_v56 = vld [vmem:[#allocation2 + $0x70] ss:$24 sps:$4 sm:$0xff]   ;;  %p3565_p7 = scmp.lt.s32.totalorder %s2639_s19, %s2639_s19 }
  0x49   :  { %v3090_v46 = vld [vmem:[#allocation5 + $0xa0] ss:$16 sps:$4 sm:$0xff]   ;;  %v3068_v49 = vld [vmem:[#allocation2 + $0xa4] ss:$24 sps:$4 sm:$0xff]   ;;  %v3071_v53 = vld [vmem:[#allocation2 + $0x74] ss:$24 sps:$4 sm:$0xff]  }
  0x4a   :  { %v3096_v50 = vld [vmem:[#allocation5 + $0x80] ss:$16 sps:$4 sm:$0xff]   ;;  %v3104_v51 = vld [vmem:[#allocation5 + $0x64] ss:$16 sps:$4 sm:$0xff]   ;;  %s3560_s20 = scalar_lea.vmem %s2639_s19, 128 }
  0x4b   :  { %419 = vmatpush1.bf16.msra.mxu0 %v3034_v19  ;;  %460 = vmatpush1.bf16.msra.mxu1 %v3035_v20  ;;  %v3066_v52 = vld [vmem:[#allocation2 + $0xa0] ss:$24 sps:$4 sm:$0xff]   ;;  %v3110_v55 = vld [vmem:[#allocation5 + $0x44] ss:$16 sps:$4 sm:$0xff]   ;;  %p3561_p6 = scmp.ne.s32.totalorder %s2639_s19, %s3560_s20  ;;  %p3566_p8 = scmp.lt.s32.totalorder %s3560_s20, %s3560_s20 }
  0x4c   :  { %420 = vmatprep.subr.bf16.mxu0 %v3036_v21  ;;  %461 = vmatprep.subr.bf16.mxu1 %v3038_v22  ;;  %v3102_v54 = vld [vmem:[#allocation5 + $0x60] ss:$16 sps:$4 sm:$0xff]   ;;  %v3074_v57 = vld [vmem:[#allocation2 + $0x44] ss:$24 sps:$4 sm:$0xff]   ;;  %v3077_v61 = vld [vmem:[#allocation2 + $0x14] ss:$24 sps:$4 sm:$0xff]  }
  0x4d   :  { %v3108_v58 = vld [vmem:[#allocation5 + $0x40] ss:$16 sps:$4 sm:$0xff]   ;;  %v3116_v59 = vld [vmem:[#allocation5 + $0x24] ss:$16 sps:$4 sm:$0xff]   ;;  %p3567_p9 = por %p3566_p8, %p3565_p7 }
  0x4e   :  { %v3072_v60 = vld [vmem:[#allocation2 + $0x40] ss:$24 sps:$4 sm:$0xff]   ;;  %v3122_v63 = vld [vmem:[#allocation5 + $0x4] ss:$16 sps:$4 sm:$0xff]  }
  0x4f   :  { %421 = vmatpush1.bf16.msra.mxu0 %v3040_v23  ;;  %462 = vmatpush1.bf16.msra.mxu1 %v3041_v24  ;;  %v3114_v62 = vld [vmem:[#allocation5 + $0x20] ss:$16 sps:$4 sm:$0xff]   ;;  %v3083_v1 = vld [vmem:[#allocation5 + $0x2e4] ss:$16 sps:$4 sm:$0xff]   ;;  %p3568_p10 = pnand %p3567_p9, %p3561_p6 }
  0x50   :  { %422 = vmatprep.subr.bf16.mxu0 %v3042_v25  ;;  %463 = vmatprep.subr.bf16.mxu1 %v3044_v26  ;;  %v3120_v2 = vld [vmem:[#allocation5] ss:$16 sps:$4 sm:$0xff]   ;;  %v3128_v3 = vld [vmem:[#allocation5 + $0x1e4] ss:$16 sps:$4 sm:$0xff]  }
  0x51   :  { %v3081_v4 = vld [vmem:[#allocation5 + $0x2e0] ss:$16 sps:$4 sm:$0xff]   ;;  %v3089_v5 = vld [vmem:[#allocation5 + $0x2c4] ss:$16 sps:$4 sm:$0xff]  }
  0x52   :  { %v3126_v6 = vld [vmem:[#allocation5 + $0x1e0] ss:$16 sps:$4 sm:$0xff]   ;;  %v3134_v7 = vld [vmem:[#allocation5 + $0x1c4] ss:$16 sps:$4 sm:$0xff]  }
  0x53   :  { %423 = vmatpush1.bf16.msra.mxu0 %v3046_v27  ;;  %464 = vmatpush1.bf16.msra.mxu1 %v3047_v28  ;;  %v3087_v8 = vld [vmem:[#allocation5 + $0x2c0] ss:$16 sps:$4 sm:$0xff]   ;;  %v3095_v9 = vld [vmem:[#allocation5 + $0x2a4] ss:$16 sps:$4 sm:$0xff]  }
  0x54   :  { %424 = vmatprep.subr.bf16.mxu0 %v3048_v29  ;;  %465 = vmatprep.subr.bf16.mxu1 %v3050_v30  ;;  %v3132_v10 = vld [vmem:[#allocation5 + $0x1c0] ss:$16 sps:$4 sm:$0xff]   ;;  %v3140_v11 = vld [vmem:[#allocation5 + $0x1a4] ss:$16 sps:$4 sm:$0xff]  }
  0x55   :  { %v3093_v12 = vld [vmem:[#allocation5 + $0x2a0] ss:$16 sps:$4 sm:$0xff]   ;;  %v3101_v13 = vld [vmem:[#allocation5 + $0x284] ss:$16 sps:$4 sm:$0xff]  }
  0x56   :  { %v3138_v14 = vld [vmem:[#allocation5 + $0x1a0] ss:$16 sps:$4 sm:$0xff]   ;;  %v3146_v15 = vld [vmem:[#allocation5 + $0x184] ss:$16 sps:$4 sm:$0xff]  }
  0x57   :  { %425 = vmatpush1.bf16.msra.mxu0 %v3052_v31  ;;  %466 = vmatpush1.bf16.msra.mxu1 %v3053_v32  ;;  %v3099_v16 = vld [vmem:[#allocation5 + $0x280] ss:$16 sps:$4 sm:$0xff]   ;;  %v3107_v17 = vld [vmem:[#allocation5 + $0x264] ss:$16 sps:$4 sm:$0xff]  }
  0x58   :  { %492 = vmatprep.subr.bf16.mxu0 %v3056_v33  ;;  %1719 = vmatprep.subr.bf16.mxu1 %v3080_v37  ;;  %v3144_v18 = vld [vmem:[#allocation5 + $0x180] ss:$16 sps:$4 sm:$0xff]   ;;  %v3152_v19 = vld [vmem:[#allocation5 + $0x164] ss:$16 sps:$4 sm:$0xff]  }
  0x59   :  { %v3105_v20 = vld [vmem:[#allocation5 + $0x260] ss:$16 sps:$4 sm:$0xff]   ;;  %v3113_v21 = vld [vmem:[#allocation5 + $0x244] ss:$16 sps:$4 sm:$0xff]  }
  0x5a   :  { %443 = vmatmul.mubr.bf16.vlgmr.msra.gmra.mxu0 %v3669_v34  ;;  %484 = vmatmul.mubr.bf16.vlgmr.msra.gmra.mxu1 %v3669_v34  ;;  %v3150_v22 = vld [vmem:[#allocation5 + $0x160] ss:$16 sps:$4 sm:$0xff]   ;;  %v3158_v23 = vld [vmem:[#allocation5 + $0x144] ss:$16 sps:$4 sm:$0xff]  }
  0x5b   :  { %493 = vmatpush1.bf16.msra.mxu0 %v3054_v35  ;;  %524 = vmatprep.mubr.bf16.mxu0 %v3600_v0  ;;  %v3075_v0 = vld [vmem:[#allocation2 + $0x10] ss:$24 sps:$4 sm:$0xff]   ;;  %v3119_v25 = vld [vmem:[#allocation5 + $0x224] ss:$16 sps:$4 sm:$0xff]  }
  0x5c   :  { %494 = vmatprep.subr.bf16.mxu0 %v3059_v36  ;;  %1720 = vmatpush1.bf16.msra.mxu1 %v3078_v38  ;;  %v3111_v24 = vld [vmem:[#allocation5 + $0x240] ss:$16 sps:$4 sm:$0xff]   ;;  %v3125_v28 = vld [vmem:[#allocation5 + $0x204] ss:$16 sps:$4 sm:$0xff]  }
  0x5d   :  { %1721 = vmatprep.subr.bf16.mxu1 %v3086_v40  ;;  %v3156_v26 = vld [vmem:[#allocation5 + $0x140] ss:$16 sps:$4 sm:$0xff]   ;;  %v3131_v30 = vld [vmem:[#allocation5 + $0x3e4] ss:$16 sps:$4 sm:$0xff]  }
  0x5e   :  { %v3117_v27 = vld [vmem:[#allocation5 + $0x220] ss:$16 sps:$4 sm:$0xff]   ;;  %v3137_v32 = vld [vmem:[#allocation5 + $0x3c4] ss:$16 sps:$4 sm:$0xff]  }
  0x5f   :  { %495 = vmatpush1.bf16.msra.mxu0 %v3057_v39  ;;  %v3123_v29 = vld [vmem:[#allocation5 + $0x200] ss:$16 sps:$4 sm:$0xff]   ;;  %v3143_v35 = vld [vmem:[#allocation5 + $0x3a4] ss:$16 sps:$4 sm:$0xff]  }
  0x60   :  { %496 = vmatprep.subr.bf16.mxu0 %v3062_v41  ;;  %1722 = vmatpush1.bf16.msra.mxu1 %v3084_v42  ;;  %v3129_v31 = vld [vmem:[#allocation5 + $0x3e0] ss:$16 sps:$4 sm:$0xff]   ;;  %v3170_v38 = vld [vmem:[#allocation5 + $0x104] ss:$16 sps:$4 sm:$0xff]  }
  0x61   :  { %1723 = vmatprep.subr.bf16.mxu1 %v3092_v43  ;;  %v3135_v33 = vld [vmem:[#allocation5 + $0x3c0] ss:$16 sps:$4 sm:$0xff]   ;;  %v3149_v39 = vld [vmem:[#allocation5 + $0x384] ss:$16 sps:$4 sm:$0xff]  }
  0x62   :  { %v3162_v36 = vld [vmem:[#allocation5 + $0x120] ss:$16 sps:$4 sm:$0xff]   ;;  %v3176_v41 = vld [vmem:[#allocation5 + $0x4e4] ss:$16 sps:$4 sm:$0xff]  }
  0x63   :  { %497 = vmatpush1.bf16.msra.mxu0 %v3060_v44  ;;  %v3141_v37 = vld [vmem:[#allocation5 + $0x3a0] ss:$16 sps:$4 sm:$0xff]   ;;  %v3155_v43 = vld [vmem:[#allocation5 + $0x364] ss:$16 sps:$4 sm:$0xff]  }
  0x64   :  { %498 = vmatprep.subr.bf16.mxu0 %v3065_v45  ;;  %1724 = vmatpush1.bf16.msra.mxu1 %v3090_v46  ;;  %v3168_v40 = vld [vmem:[#allocation5 + $0x100] ss:$16 sps:$4 sm:$0xff]   ;;  %v3161_v45 = vld [vmem:[#allocation5 + $0x344] ss:$16 sps:$4 sm:$0xff]  }
  0x65   :  { %1725 = vmatprep.subr.bf16.mxu1 %v3098_v47  ;;  %v3147_v42 = vld [vmem:[#allocation5 + $0x380] ss:$16 sps:$4 sm:$0xff]   ;;  %v3167_v47 = vld [vmem:[#allocation5 + $0x324] ss:$16 sps:$4 sm:$0xff]  }
  0x66   :  { %v3153_v44 = vld [vmem:[#allocation5 + $0x360] ss:$16 sps:$4 sm:$0xff]  }
  0x67   :  { %499 = vmatpush1.bf16.msra.mxu0 %v3063_v48  ;;  %v3159_v46 = vld [vmem:[#allocation5 + $0x340] ss:$16 sps:$4 sm:$0xff]  }
  0x68   :  { %500 = vmatprep.subr.bf16.mxu0 %v3068_v49  ;;  %1726 = vmatpush1.bf16.msra.mxu1 %v3096_v50  ;;  %v3165_v48 = vld [vmem:[#allocation5 + $0x320] ss:$16 sps:$4 sm:$0xff]   ;;  %v3173_v49 = vld [vmem:[#allocation5 + $0x304] ss:$16 sps:$4 sm:$0xff]  }
  0x69   :  { %1727 = vmatprep.subr.bf16.mxu1 %v3104_v51  ;;  %v3171_v50 = vld [vmem:[#allocation5 + $0x300] ss:$16 sps:$4 sm:$0xff]   ;;  %v3179_v51 = vld [vmem:[#allocation5 + $0xec] ss:$16 sps:$4 sm:$0xff]  }
  0x6b   :  { %501 = vmatpush1.bf16.msra.mxu0 %v3066_v52  ;;  %v140_v52 = vlaneseq }
  0x6c   :  { %502 = vmatprep.subr.bf16.mxu0 %v3071_v53  ;;  %1728 = vmatpush1.bf16.msra.mxu1 %v3102_v54 }
  0x6d   :  { %1729 = vmatprep.subr.bf16.mxu1 %v3110_v55  ;;  %v3675_v53 = vshrl.u32 %v140_v52, 7  ;;  %v3219_v52 = vld [vmem:[#allocation5 + $0x8] ss:$16 sps:$4 sm:$0xff]  }
  0x6f   :  { %503 = vmatpush1.bf16.msra.mxu0 %v3069_v56  ;;  %v3678_v54 = vsub.s32 0, %v3675_v53  ;;  %v150_v55 = vsub.s32 2, %v3675_v53  ;;  %v3684_v56 = vld [vmem:[%s3749_s2] sm:$0x3f] }
  0x70   :  { %504 = vmatprep.subr.bf16.mxu0 %v3074_v57  ;;  %1730 = vmatpush1.bf16.msra.mxu1 %v3108_v58  ;;  %v3687_v57 = vsub.s32 1, %v3675_v53  ;;  %v154_v58 = vsub.s32 3, %v3675_v53 }
  0x71   :  { %1731 = vmatprep.subr.bf16.mxu1 %v3116_v59  ;;  %v143_v59 = vrot.slane %v3684_v56, %v3678_v54 }
  0x73   :  { %505 = vmatpush1.bf16.msra.mxu0 %v3072_v60  ;;  %v151_v60 = vrot.slane %v3684_v56, %v150_v55 }
  0x74   :  { %506 = vmatprep.subr.bf16.mxu0 %v3077_v61  ;;  %1732 = vmatpush1.bf16.msra.mxu1 %v3114_v62  ;;  %v147_v61 = vrot.slane %v3684_v56, %v3687_v57  ;;  %v155_v62 = vrot.slane %v3684_v56, %v154_v58 }
  0x75   :  { %1733 = vmatprep.subr.bf16.mxu1 %v3122_v63 }
  0x77   :  { %507 = vmatpush1.bf16.msra.mxu0 %v3075_v0 }
  0x78   :  { %1760 = vmatprep.subr.bf16.mxu0 %v3083_v1  ;;  %1734 = vmatpush1.bf16.msra.mxu1 %v3120_v2 }
  0x79   :  { %1735 = vmatprep.subr.bf16.mxu1 %v3128_v3 }
  0x7a   :  { %525 = vmatmul.mubr.bf16.vlgmr.msra.gmra.mxu0 %v3669_v34  ;;  %v3164_v34 = vld [vmem:[#allocation5 + $0x124] ss:$16 sps:$4 sm:$0xff]  }
  0x7b   :  { %1761 = vmatpush1.bf16.msra.mxu0 %v3081_v4 }
  0x7c   :  { %1762 = vmatprep.subr.bf16.mxu0 %v3089_v5  ;;  %1736 = vmatpush2.bf16.msra.mxu1 %v3126_v6 }
  0x7d   :  { %1737 = vmatprep.subr.bf16.mxu1 %v3134_v7 }
  0x7f   :  { %1763 = vmatpush1.bf16.msra.mxu0 %v3087_v8 }
  0x80   :  { %1764 = vmatprep.subr.bf16.mxu0 %v3095_v9  ;;  %1738 = vmatpush2.bf16.msra.mxu1 %v3132_v10 }
  0x81   :  { %1739 = vmatprep.subr.bf16.mxu1 %v3140_v11 }
  0x83   :  { %1765 = vmatpush1.bf16.msra.mxu0 %v3093_v12 }
  0x84   :  { %1766 = vmatprep.subr.bf16.mxu0 %v3101_v13  ;;  %1740 = vmatpush2.bf16.msra.mxu1 %v3138_v14 }
  0x85   :  { %1741 = vmatprep.subr.bf16.mxu1 %v3146_v15 }
  0x87   :  { %1767 = vmatpush1.bf16.msra.mxu0 %v3099_v16 }
  0x88   :  { %1768 = vmatprep.subr.bf16.mxu0 %v3107_v17  ;;  %1742 = vmatpush2.bf16.msra.mxu1 %v3144_v18  ;;  %v3174_v18 = vld [vmem:[#allocation5 + $0x4e0] ss:$16 sps:$4 sm:$0xff]  }
  0x89   :  { %1743 = vmatprep.subr.bf16.mxu1 %v3152_v19  ;;  %v3177_v19 = vld [vmem:[#allocation5 + $0xe8] ss:$16 sps:$4 sm:$0xff]  }
  0x8b   :  { %1769 = vmatpush1.bf16.msra.mxu0 %v3105_v20 }
  0x8c   :  { %1770 = vmatprep.subr.bf16.mxu0 %v3113_v21  ;;  %1744 = vmatpush2.bf16.msra.mxu1 %v3150_v22  ;;  %v3182_v21 = vld [vmem:[#allocation5 + $0x4c4] ss:$16 sps:$4 sm:$0xff]   ;;  %v3185_v22 = vld [vmem:[#allocation5 + $0xcc] ss:$16 sps:$4 sm:$0xff]  }
  0x8d   :  { %1745 = vmatprep.subr.bf16.mxu1 %v3158_v23  ;;  %v3180_v23 = vld [vmem:[#allocation5 + $0x4c0] ss:$16 sps:$4 sm:$0xff]  }
  0x8f   :  { %1771 = vmatpush1.bf16.msra.mxu0 %v3111_v24  ;;  %v3183_v24 = vld [vmem:[#allocation5 + $0xc8] ss:$16 sps:$4 sm:$0xff]  }
  0x90   :  { %1772 = vmatprep.subr.bf16.mxu0 %v3119_v25  ;;  %1746 = vmatpush2.bf16.msra.mxu1 %v3156_v26  ;;  %v3188_v25 = vld [vmem:[#allocation5 + $0x4a4] ss:$16 sps:$4 sm:$0xff]   ;;  %v3191_v26 = vld [vmem:[#allocation5 + $0xac] ss:$16 sps:$4 sm:$0xff]  }
  0x91   :  { %1747 = vmatprep.subr.bf16.mxu1 %v3164_v34  ;;  %v3203_v34 = vld [vmem:[#allocation5 + $0x6c] ss:$16 sps:$4 sm:$0xff]  }
  0x93   :  { %1773 = vmatpush1.bf16.msra.mxu0 %v3117_v27  ;;  %v3186_v27 = vld [vmem:[#allocation5 + $0x4a0] ss:$16 sps:$4 sm:$0xff]  }
  0x94   :  { %1774 = vmatprep.subr.bf16.mxu0 %v3125_v28  ;;  %1748 = vmatpush2.bf16.msra.mxu1 %v3162_v36  ;;  %v3189_v28 = vld [vmem:[#allocation5 + $0xa8] ss:$16 sps:$4 sm:$0xff]  }
  0x95   :  { %1749 = vmatprep.subr.bf16.mxu1 %v3170_v38  ;;  %v3201_v36 = vld [vmem:[#allocation5 + $0x68] ss:$16 sps:$4 sm:$0xff]   ;;  %v3209_v38 = vld [vmem:[#allocation5 + $0x4c] ss:$16 sps:$4 sm:$0xff]  }
  0x97   :  { %1775 = vmatpush1.bf16.msra.mxu0 %v3123_v29  ;;  %v3194_v29 = vld [vmem:[#allocation5 + $0x484] ss:$16 sps:$4 sm:$0xff]  }
  0x98   :  { %1776 = vmatprep.subr.bf16.mxu0 %v3131_v30  ;;  %1750 = vmatpush2.bf16.msra.mxu1 %v3168_v40  ;;  %v3197_v30 = vld [vmem:[#allocation5 + $0x8c] ss:$16 sps:$4 sm:$0xff]   ;;  %v3207_v40 = vld [vmem:[#allocation5 + $0x48] ss:$16 sps:$4 sm:$0xff]  }
  0x99   :  { %1801 = vmatprep.subr.bf16.mxu1 %v3176_v41  ;;  %v162_v41 = vsub.s32 5, %v3675_v53 }
  0x9b   :  { %1777 = vmatpush2.bf16.msra.mxu0 %v3129_v31  ;;  %v3192_v31 = vld [vmem:[#allocation5 + $0x480] ss:$16 sps:$4 sm:$0xff]  }
  0x9c   :  { %1778 = vmatprep.subr.bf16.mxu0 %v3137_v32  ;;  %v3195_v32 = vld [vmem:[#allocation5 + $0x88] ss:$16 sps:$4 sm:$0xff]  }
  0x9f   :  { %1779 = vmatpush2.bf16.msra.mxu0 %v3135_v33  ;;  %v3200_v33 = vld [vmem:[#allocation5 + $0x464] ss:$16 sps:$4 sm:$0xff]  }
  0xa0   :  { %1780 = vmatprep.subr.bf16.mxu0 %v3143_v35  ;;  %v3198_v35 = vld [vmem:[#allocation5 + $0x460] ss:$16 sps:$4 sm:$0xff]  }
  0xa3   :  { %1781 = vmatpush2.bf16.msra.mxu0 %v3141_v37  ;;  %v3206_v37 = vld [vmem:[#allocation5 + $0x444] ss:$16 sps:$4 sm:$0xff]  }
  0xa4   :  { %1782 = vmatprep.subr.bf16.mxu0 %v3149_v39  ;;  %v3204_v39 = vld [vmem:[#allocation5 + $0x440] ss:$16 sps:$4 sm:$0xff]  }
  0xa7   :  { %1783 = vmatpush2.bf16.msra.mxu0 %v3147_v42  ;;  %v3212_v42 = vld [vmem:[#allocation5 + $0x424] ss:$16 sps:$4 sm:$0xff]  }
  0xa8   :  { %1784 = vmatprep.subr.bf16.mxu0 %v3155_v43  ;;  %v3215_v43 = vld [vmem:[#allocation5 + $0x2c] ss:$16 sps:$4 sm:$0xff]  }
  0xab   :  { %1785 = vmatpush2.bf16.msra.mxu0 %v3153_v44  ;;  %v3210_v44 = vld [vmem:[#allocation5 + $0x420] ss:$16 sps:$4 sm:$0xff]  }
  0xac   :  { %1786 = vmatprep.subr.bf16.mxu0 %v3161_v45  ;;  %v3213_v45 = vld [vmem:[#allocation5 + $0x28] ss:$16 sps:$4 sm:$0xff]  }
  0xaf   :  { %1787 = vmatpush2.bf16.msra.mxu0 %v3159_v46  ;;  %v163_v46 = vrot.slane %v3684_v56, %v162_v41 }
  0xb0   :  { %1788 = vmatprep.subr.bf16.mxu0 %v3167_v47  ;;  %v3218_v47 = vld [vmem:[#allocation5 + $0x404] ss:$16 sps:$4 sm:$0xff]  }
  0xb3   :  { %1789 = vmatpush2.bf16.msra.mxu0 %v3165_v48  ;;  %v3221_v48 = vld [vmem:[#allocation5 + $0xc] ss:$16 sps:$4 sm:$0xff]  }
  0xb4   :  { %1790 = vmatprep.subr.bf16.mxu0 %v3173_v49 }
  0xb7   :  { %1791 = vmatpush2.bf16.msra.mxu0 %v3171_v50 }
  0xb8   :  { %1842 = vmatprep.subr.bf16.mxu0 %v3179_v51  ;;  %v3216_v51 = vld [vmem:[#allocation5 + $0x400] ss:$16 sps:$4 sm:$0xff]  }
 0x11a   :  { %v444_v63 = vpop.f32.mrf.mxu0  ;;  %v485_v0 = vpop.f32.mrf.mxu1 }
 0x11b   :  { %v445_v1 = vadd.f32 %v444_v63, %v143_v59  ;;  %v486_v2 = vadd.f32 %v485_v0, %v151_v60  ;;  %v3224_v60 = vld [vmem:[#allocation5 + $0x5e4] ss:$16 sps:$4 sm:$0xff]  }
 0x11c   :  { %v446_v3 = vpop.f32.mrf.mxu0  ;;  %v487_v4 = vpop.f32.mrf.mxu1 }
 0x11d   :  { %v535_v5 = vmax.f32 %v486_v2, 0.0  ;;  %v447_v6 = vadd.f32 %v446_v3, %v147_v61  ;;  %v488_v7 = vadd.f32 %v487_v4, %v155_v62  ;;  %v533_v8 = vmax.f32 %v445_v1, 0.0  ;;  %v3227_v61 = vld [vmem:[#allocation5 + $0x1ec] ss:$16 sps:$4 sm:$0xff]   ;;  %v3222_v1 = vld [vmem:[#allocation5 + $0x5e0] ss:$16 sps:$4 sm:$0xff]  }
 0x11e   :  { %v448_v9 = vpop.f32.mrf.mxu0  ;;  %v489_v10 = vpop.f32.mrf.mxu1  ;;  %v3225_v2 = vld [vmem:[#allocation5 + $0x1e8] ss:$16 sps:$4 sm:$0xff]   ;;  %v3230_v4 = vld [vmem:[#allocation5 + $0x5c4] ss:$16 sps:$4 sm:$0xff]  }
 0x11f   :  { %v534_v11 = vmax.f32 %v447_v6, 0.0  ;;  %v536_v12 = vmax.f32 %v488_v7, 0.0  ;;  %v3700_v13 = vpack.c.bf16 %v535_v5, %v535_v5  ;;  %v3704_v20 = vpack.c.bf16 %v533_v8, %v533_v8  ;;  %v3233_v5 = vld [vmem:[#allocation5 + $0x1cc] ss:$16 sps:$4 sm:$0xff]   ;;  %v3228_v6 = vld [vmem:[#allocation5 + $0x5c0] ss:$16 sps:$4 sm:$0xff]  }
 0x120   :  { %v449_v14 = vpop.f32.mrf.mxu0  ;;  %v490_v15 = vpop.f32.mrf.mxu1  ;;  %v3231_v7 = vld [vmem:[#allocation5 + $0x1c8] ss:$16 sps:$4 sm:$0xff]   ;;  %v3236_v8 = vld [vmem:[#allocation5 + $0x5a4] ss:$16 sps:$4 sm:$0xff]   ;;  %v3239_v9 = vld [vmem:[#allocation5 + $0x1ac] ss:$16 sps:$4 sm:$0xff]  }
 0x121   :  { %v540_v16 = vpack.c.bf16 %v534_v11, %v534_v11  ;;  %v3702_v17 = vpack.c.bf16 %v536_v12, %v536_v12  ;;  %v3234_v10 = vld [vmem:[#allocation5 + $0x5a0] ss:$16 sps:$4 sm:$0xff]   ;;  %v3237_v11 = vld [vmem:[#allocation5 + $0x1a8] ss:$16 sps:$4 sm:$0xff]   ;;  %v3242_v12 = vld [vmem:[#allocation5 + $0x584] ss:$16 sps:$4 sm:$0xff]  }
 0x122   :  { %v3245_v14 = vld [vmem:[#allocation5 + $0x18c] ss:$16 sps:$4 sm:$0xff]   ;;  %v3240_v15 = vld [vmem:[#allocation5 + $0x580] ss:$16 sps:$4 sm:$0xff]  }
 0x123   :  { %1751 = vmatprep.mubr.bf16.mxu1 %v540_v16  ;;  %1792 = vmatprep.mubr.bf16.mxu0 %v3702_v17 }
 0x124   :  { %1752 = vmatmul.mubr.bf16.vlgmr.msra.gmra.mxu1 %v3704_v20  ;;  %1793 = vmatmul.mubr.bf16.vlgmr.msra.gmra.mxu0 %v3700_v13 }
 0x125   :  { %1802 = vmatpush1.bf16.msra.mxu1 %v3174_v18  ;;  %1843 = vmatpush1.bf16.msra.mxu0 %v3177_v19  ;;  %v3248_v18 = vld [vmem:[#allocation5 + $0x564] ss:$16 sps:$4 sm:$0xff]   ;;  %v3251_v19 = vld [vmem:[#allocation5 + $0x16c] ss:$16 sps:$4 sm:$0xff]  }
 0x126   :  { %1874 = vmatprep.mubr.bf16.mxu0 %v540_v16  ;;  %1803 = vmatprep.subr.bf16.mxu1 %v3182_v21  ;;  %v3243_v16 = vld [vmem:[#allocation5 + $0x188] ss:$16 sps:$4 sm:$0xff]   ;;  %v3246_v21 = vld [vmem:[#allocation5 + $0x560] ss:$16 sps:$4 sm:$0xff]  }
 0x127   :  { %1844 = vmatprep.subr.bf16.mxu0 %v3185_v22  ;;  %v3249_v22 = vld [vmem:[#allocation5 + $0x168] ss:$16 sps:$4 sm:$0xff]  }
 0x129   :  { %1804 = vmatpush1.bf16.msra.mxu1 %v3180_v23  ;;  %1845 = vmatpush1.bf16.msra.mxu0 %v3183_v24  ;;  %v158_v23 = vsub.s32 4, %v3675_v53  ;;  %v3254_v24 = vld [vmem:[#allocation5 + $0x544] ss:$16 sps:$4 sm:$0xff]   ;;  %v3462_v53 = vld [vmem:[#allocation8 + $0x78] sm:$0xff]  }
 0x12a   :  { %1805 = vmatprep.subr.bf16.mxu1 %v3188_v25  ;;  %1846 = vmatprep.subr.bf16.mxu0 %v3191_v26  ;;  %v3257_v25 = vld [vmem:[#allocation5 + $0x14c] ss:$16 sps:$4 sm:$0xff]   ;;  %v3252_v26 = vld [vmem:[#allocation5 + $0x540] ss:$16 sps:$4 sm:$0xff]  }
 0x12d   :  { %1806 = vmatpush1.bf16.msra.mxu1 %v3186_v27  ;;  %1847 = vmatpush1.bf16.msra.mxu0 %v3189_v28  ;;  %v3255_v27 = vld [vmem:[#allocation5 + $0x148] ss:$16 sps:$4 sm:$0xff]   ;;  %v159_v28 = vrot.slane %v3684_v56, %v158_v23  ;;  %v3272_v56 = vld [vmem:[#allocation5 + $0x2ec] ss:$16 sps:$4 sm:$0xff]  }
 0x12e   :  { %1807 = vmatprep.subr.bf16.mxu1 %v3194_v29  ;;  %1848 = vmatprep.subr.bf16.mxu0 %v3197_v30  ;;  %v3260_v29 = vld [vmem:[#allocation5 + $0x524] ss:$16 sps:$4 sm:$0xff]   ;;  %v3263_v30 = vld [vmem:[#allocation5 + $0x12c] ss:$16 sps:$4 sm:$0xff]  }
 0x12f   :  { %v3335_v23 = vld [vmem:[#allocation5 + $0x5ac] ss:$16 sps:$4 sm:$0xff]  }
 0x131   :  { %1808 = vmatpush1.bf16.msra.mxu1 %v3192_v31  ;;  %1849 = vmatpush1.bf16.msra.mxu0 %v3195_v32  ;;  %v3258_v31 = vld [vmem:[#allocation5 + $0x520] ss:$16 sps:$4 sm:$0xff]   ;;  %v3261_v32 = vld [vmem:[#allocation5 + $0x128] ss:$16 sps:$4 sm:$0xff]  }
 0x132   :  { %1809 = vmatprep.subr.bf16.mxu1 %v3200_v33  ;;  %1850 = vmatprep.subr.bf16.mxu0 %v3203_v34  ;;  %v3266_v34 = vld [vmem:[#allocation5 + $0x504] ss:$16 sps:$4 sm:$0xff]  }
 0x135   :  { %1810 = vmatpush1.bf16.msra.mxu1 %v3198_v35  ;;  %1851 = vmatpush1.bf16.msra.mxu0 %v3201_v36  ;;  %v3269_v35 = vld [vmem:[#allocation5 + $0x10c] ss:$16 sps:$4 sm:$0xff]   ;;  %v3264_v36 = vld [vmem:[#allocation5 + $0x500] ss:$16 sps:$4 sm:$0xff]  }
 0x136   :  { %1811 = vmatprep.subr.bf16.mxu1 %v3206_v37  ;;  %1852 = vmatprep.subr.bf16.mxu0 %v3209_v38  ;;  %v3267_v37 = vld [vmem:[#allocation5 + $0x108] ss:$16 sps:$4 sm:$0xff]  }
 0x139   :  { %1812 = vmatpush1.bf16.msra.mxu1 %v3204_v39  ;;  %1853 = vmatpush1.bf16.msra.mxu0 %v3207_v40  ;;  %v3275_v39 = vld [vmem:[#allocation5 + $0x4ec] ss:$16 sps:$4 sm:$0xff]   ;;  %v3270_v40 = vld [vmem:[#allocation5 + $0x2e8] ss:$16 sps:$4 sm:$0xff]  }
 0x13a   :  { %1813 = vmatprep.subr.bf16.mxu1 %v3212_v42  ;;  %1854 = vmatprep.subr.bf16.mxu0 %v3215_v43  ;;  %v3711_v49 = vpop.f32.mrf.mxu0  ;;  %v3273_v42 = vld [vmem:[#allocation5 + $0x4e8] ss:$16 sps:$4 sm:$0xff]   ;;  %v3278_v43 = vld [vmem:[#allocation5 + $0x2cc] ss:$16 sps:$4 sm:$0xff]  }
 0x13b   :  { %v527_v33 = vadd.f32 %v3711_v49, %v159_v28  ;;  %v3282_v49 = vld [vmem:[#allocation5 + $0x2a8] ss:$16 sps:$4 sm:$0xff]  }
 0x13c   :  { %v528_v50 = vpop.f32.mrf.mxu0  ;;  %v3336_v28 = vld [vmem:[#allocation5 + $0x388] ss:$16 sps:$4 sm:$0xff]  }
 0x13d   :  { %1814 = vmatpush1.bf16.msra.mxu1 %v3210_v44  ;;  %1855 = vmatpush1.bf16.msra.mxu0 %v3213_v45  ;;  %v529_v59 = vadd.f32 %v528_v50, %v163_v46  ;;  %v537_v38 = vmax.f32 %v527_v33, 0.0  ;;  %v3281_v44 = vld [vmem:[#allocation5 + $0x4cc] ss:$16 sps:$4 sm:$0xff]   ;;  %v3276_v45 = vld [vmem:[#allocation5 + $0x2c8] ss:$16 sps:$4 sm:$0xff]  }
 0x13e   :  { %1815 = vmatprep.subr.bf16.mxu1 %v3218_v47  ;;  %1856 = vmatprep.subr.bf16.mxu0 %v3221_v48  ;;  %v530_v62 = vpop.f32.mrf.mxu0  ;;  %v3279_v46 = vld [vmem:[#allocation5 + $0x4c8] ss:$16 sps:$4 sm:$0xff]   ;;  %v3284_v47 = vld [vmem:[#allocation5 + $0x2ac] ss:$16 sps:$4 sm:$0xff]  }
 0x13f   :  { %v538_v63 = vmax.f32 %v529_v59, 0.0  ;;  %v3719_v41 = vpack.c.bf16 %v537_v38, %v537_v38  ;;  %v3287_v48 = vld [vmem:[#allocation5 + $0x4ac] ss:$16 sps:$4 sm:$0xff]   ;;  %v3285_v50 = vld [vmem:[#allocation5 + $0x4a8] ss:$16 sps:$4 sm:$0xff]  }
 0x140   :  { %v531_v0 = vpop.f32.mrf.mxu0  ;;  %v3296_v59 = vld [vmem:[#allocation5 + $0x26c] ss:$16 sps:$4 sm:$0xff]   ;;  %v3297_v62 = vld [vmem:[#allocation5 + $0x468] ss:$16 sps:$4 sm:$0xff]  }
 0x141   :  { %1816 = vmatpush1.bf16.msra.mxu1 %v3216_v51  ;;  %1857 = vmatpush1.bf16.msra.mxu0 %v3219_v52  ;;  %v3713_v3 = vpack.c.bf16 %v538_v63, %v538_v63  ;;  %v3290_v51 = vld [vmem:[#allocation5 + $0x28c] ss:$16 sps:$4 sm:$0xff]   ;;  %v3288_v52 = vld [vmem:[#allocation5 + $0x288] ss:$16 sps:$4 sm:$0xff]  }
 0x142   :  { %1817 = vmatprep.subr.bf16.mxu1 %v3224_v60  ;;  %1858 = vmatprep.subr.bf16.mxu0 %v3227_v61  ;;  %v3299_v60 = vld [vmem:[#allocation5 + $0x46c] ss:$16 sps:$4 sm:$0xff]   ;;  %v3294_v61 = vld [vmem:[#allocation5 + $0x268] ss:$16 sps:$4 sm:$0xff]  }
 0x143   :  { %1833 = vmatprep.mubr.bf16.mxu1 %v3713_v3  ;;  %v3302_v63 = vld [vmem:[#allocation5 + $0x24c] ss:$16 sps:$4 sm:$0xff]   ;;  %v3345_v33 = vld [vmem:[#allocation5 + $0x568] ss:$16 sps:$4 sm:$0xff]  }
 0x144   :  { %v3305_v0 = vld [vmem:[#allocation5 + $0x44c] ss:$16 sps:$4 sm:$0xff]  }
 0x145   :  { %1818 = vmatpush2.bf16.msra.mxu1 %v3222_v1  ;;  %1859 = vmatpush2.bf16.msra.mxu0 %v3225_v2  ;;  %v3300_v1 = vld [vmem:[#allocation5 + $0x248] ss:$16 sps:$4 sm:$0xff]   ;;  %v3356_v38 = vld [vmem:[#allocation5 + $0x32c] ss:$16 sps:$4 sm:$0xff]  }
 0x146   :  { %1819 = vmatprep.subr.bf16.mxu1 %v3230_v4  ;;  %1860 = vmatprep.subr.bf16.mxu0 %v3233_v5  ;;  %v3303_v2 = vld [vmem:[#allocation5 + $0x448] ss:$16 sps:$4 sm:$0xff]   ;;  %v3311_v4 = vld [vmem:[#allocation5 + $0x42c] ss:$16 sps:$4 sm:$0xff]  }
 0x147   :  { %v3306_v5 = vld [vmem:[#allocation5 + $0x228] ss:$16 sps:$4 sm:$0xff]  }
 0x149   :  { %1820 = vmatpush2.bf16.msra.mxu1 %v3228_v6  ;;  %1861 = vmatpush2.bf16.msra.mxu0 %v3231_v7  ;;  %v3309_v6 = vld [vmem:[#allocation5 + $0x428] ss:$16 sps:$4 sm:$0xff]   ;;  %v3314_v7 = vld [vmem:[#allocation5 + $0x20c] ss:$16 sps:$4 sm:$0xff]  }
 0x14a   :  { %1821 = vmatprep.subr.bf16.mxu1 %v3236_v8  ;;  %1862 = vmatprep.subr.bf16.mxu0 %v3239_v9  ;;  %v3317_v8 = vld [vmem:[#allocation5 + $0x40c] ss:$16 sps:$4 sm:$0xff]   ;;  %v3312_v9 = vld [vmem:[#allocation5 + $0x208] ss:$16 sps:$4 sm:$0xff]  }
 0x14d   :  { %1822 = vmatpush2.bf16.msra.mxu1 %v3234_v10  ;;  %1863 = vmatpush2.bf16.msra.mxu0 %v3237_v11  ;;  %v3315_v10 = vld [vmem:[#allocation5 + $0x408] ss:$16 sps:$4 sm:$0xff]   ;;  %v3320_v11 = vld [vmem:[#allocation5 + $0x3ec] ss:$16 sps:$4 sm:$0xff]  }
 0x14e   :  { %1823 = vmatprep.subr.bf16.mxu1 %v3242_v12  ;;  %1864 = vmatprep.subr.bf16.mxu0 %v3245_v14  ;;  %v3323_v12 = vld [vmem:[#allocation5 + $0x5ec] ss:$16 sps:$4 sm:$0xff]   ;;  %v3318_v14 = vld [vmem:[#allocation5 + $0x3e8] ss:$16 sps:$4 sm:$0xff]  }
 0x151   :  { %1824 = vmatpush2.bf16.msra.mxu1 %v3240_v15  ;;  %1865 = vmatpush2.bf16.msra.mxu0 %v3243_v16  ;;  %v3321_v15 = vld [vmem:[#allocation5 + $0x5e8] ss:$16 sps:$4 sm:$0xff]   ;;  %v3326_v16 = vld [vmem:[#allocation5 + $0x3cc] ss:$16 sps:$4 sm:$0xff]  }
 0x152   :  { %1825 = vmatprep.subr.bf16.mxu1 %v3248_v18  ;;  %1866 = vmatprep.subr.bf16.mxu0 %v3251_v19  ;;  %v3329_v18 = vld [vmem:[#allocation5 + $0x5cc] ss:$16 sps:$4 sm:$0xff]   ;;  %v3324_v19 = vld [vmem:[#allocation5 + $0x3c8] ss:$16 sps:$4 sm:$0xff]  }
 0x155   :  { %1826 = vmatpush2.bf16.msra.mxu1 %v3246_v21  ;;  %1867 = vmatpush2.bf16.msra.mxu0 %v3249_v22  ;;  %v3327_v21 = vld [vmem:[#allocation5 + $0x5c8] ss:$16 sps:$4 sm:$0xff]   ;;  %v3332_v22 = vld [vmem:[#allocation5 + $0x3ac] ss:$16 sps:$4 sm:$0xff]  }
 0x156   :  { %1827 = vmatprep.subr.bf16.mxu1 %v3254_v24  ;;  %1868 = vmatprep.subr.bf16.mxu0 %v3257_v25  ;;  %v3330_v24 = vld [vmem:[#allocation5 + $0x3a8] ss:$16 sps:$4 sm:$0xff]  }
 0x157   :  { %v3333_v25 = vld [vmem:[#allocation5 + $0x5a8] ss:$16 sps:$4 sm:$0xff]  }
 0x159   :  { %1828 = vmatpush2.bf16.msra.mxu1 %v3252_v26  ;;  %1869 = vmatpush2.bf16.msra.mxu0 %v3255_v27  ;;  %v3338_v26 = vld [vmem:[#allocation5 + $0x38c] ss:$16 sps:$4 sm:$0xff]  }
 0x15a   :  { %1829 = vmatprep.subr.bf16.mxu1 %v3260_v29  ;;  %1870 = vmatprep.subr.bf16.mxu0 %v3263_v30  ;;  %v3341_v27 = vld [vmem:[#allocation5 + $0x58c] ss:$16 sps:$4 sm:$0xff]   ;;  %v3339_v29 = vld [vmem:[#allocation5 + $0x588] ss:$16 sps:$4 sm:$0xff]  }
 0x15b   :  { %v3344_v30 = vld [vmem:[#allocation5 + $0x36c] ss:$16 sps:$4 sm:$0xff]  }
 0x15d   :  { %1830 = vmatpush2.bf16.msra.mxu1 %v3258_v31  ;;  %1871 = vmatpush2.bf16.msra.mxu0 %v3261_v32  ;;  %v3347_v31 = vld [vmem:[#allocation5 + $0x56c] ss:$16 sps:$4 sm:$0xff]   ;;  %v3342_v32 = vld [vmem:[#allocation5 + $0x368] ss:$16 sps:$4 sm:$0xff]  }
 0x15e   :  { %1831 = vmatprep.subr.bf16.mxu1 %v3266_v34  ;;  %1872 = vmatprep.subr.bf16.mxu0 %v3269_v35  ;;  %v3350_v34 = vld [vmem:[#allocation5 + $0x34c] ss:$16 sps:$4 sm:$0xff]  }
 0x15f   :  { %v3353_v35 = vld [vmem:[#allocation5 + $0x54c] ss:$16 sps:$4 sm:$0xff]  }
 0x161   :  { %1832 = vmatpush2.bf16.msra.mxu1 %v3264_v36  ;;  %1873 = vmatpush2.bf16.msra.mxu0 %v3267_v37  ;;  %v3348_v36 = vld [vmem:[#allocation5 + $0x348] ss:$16 sps:$4 sm:$0xff]  }
 0x162   :  { %1883 = vmatprep.subr.bf16.mxu1 %v3272_v56  ;;  %1924 = vmatprep.subr.bf16.mxu0 %v3275_v39  ;;  %v3351_v37 = vld [vmem:[#allocation5 + $0x548] ss:$16 sps:$4 sm:$0xff]   ;;  %v3359_v56 = vld [vmem:[#allocation5 + $0x52c] ss:$16 sps:$4 sm:$0xff]  }
 0x163   :  { %v3354_v39 = vld [vmem:[#allocation5 + $0x328] ss:$16 sps:$4 sm:$0xff]  }
 0x164   :  { %1834 = vmatmul.mubr.bf16.vlgmr.msra.gmra.mxu1 %v3719_v41  ;;  %1875 = vmatmul.mubr.bf16.vlgmr.msra.gmra.mxu0 %v3704_v20  ;;  %v3293_v20 = vld [vmem:[#allocation5 + $0x48c] ss:$16 sps:$4 sm:$0xff]  }
 0x165   :  { %1884 = vmatpush1.bf16.msra.mxu1 %v3270_v40  ;;  %1915 = vmatprep.mubr.bf16.mxu1 %v3702_v17  ;;  %v3291_v17 = vld [vmem:[#allocation5 + $0x488] ss:$16 sps:$4 sm:$0xff]  }
 0x166   :  { %1925 = vmatpush1.bf16.msra.mxu0 %v3273_v42  ;;  %1956 = vmatprep.mubr.bf16.mxu0 %v3713_v3  ;;  %v3308_v3 = vld [vmem:[#allocation5 + $0x22c] ss:$16 sps:$4 sm:$0xff]   ;;  %v3357_v40 = vld [vmem:[#allocation5 + $0x528] ss:$16 sps:$4 sm:$0xff]  }
 0x167   :  { %1885 = vmatprep.subr.bf16.mxu1 %v3278_v43  ;;  %1926 = vmatprep.subr.bf16.mxu0 %v3281_v44  ;;  %v3362_v42 = vld [vmem:[#allocation5 + $0x30c] ss:$16 sps:$4 sm:$0xff]   ;;  %v3360_v44 = vld [vmem:[#allocation5 + $0x308] ss:$16 sps:$4 sm:$0xff]  }
 0x168   :  { %v3365_v43 = vld [vmem:[#allocation5 + $0x50c] ss:$16 sps:$4 sm:$0xff]  }
 0x169   :  { %1886 = vmatpush1.bf16.msra.mxu1 %v3276_v45  ;;  %v3363_v45 = vld [vmem:[#allocation5 + $0x508] ss:$16 sps:$4 sm:$0xff]  }
 0x16a   :  { %1927 = vmatpush1.bf16.msra.mxu0 %v3279_v46  ;;  %1887 = vmatprep.subr.bf16.mxu1 %v3284_v47  ;;  %v3368_v46 = vld [vmem:[#allocation7 + $0x74] ss:$8 sps:$4 sm:$0xff]   ;;  %v3366_v47 = vld [vmem:[#allocation7 + $0x70] ss:$8 sps:$4 sm:$0xff]  }
 0x16b   :  { %1928 = vmatprep.subr.bf16.mxu0 %v3287_v48  ;;  %v3371_v48 = vld [vmem:[#allocation7 + $0x64] ss:$8 sps:$4 sm:$0xff]  }
 0x16d   :  { %1888 = vmatpush1.bf16.msra.mxu1 %v3282_v49  ;;  %v3369_v49 = vld [vmem:[#allocation7 + $0x60] ss:$8 sps:$4 sm:$0xff]  }
 0x16e   :  { %1929 = vmatpush1.bf16.msra.mxu0 %v3285_v50  ;;  %1889 = vmatprep.subr.bf16.mxu1 %v3290_v51  ;;  %v3374_v50 = vld [vmem:[#allocation7 + $0x54] ss:$8 sps:$4 sm:$0xff]   ;;  %v3372_v51 = vld [vmem:[#allocation7 + $0x50] ss:$8 sps:$4 sm:$0xff]  }
 0x16f   :  { %1930 = vmatprep.subr.bf16.mxu0 %v3293_v20  ;;  %v3377_v20 = vld [vmem:[#allocation7 + $0x44] ss:$8 sps:$4 sm:$0xff]  }
 0x171   :  { %1890 = vmatpush1.bf16.msra.mxu1 %v3288_v52  ;;  %v3375_v52 = vld [vmem:[#allocation7 + $0x40] ss:$8 sps:$4 sm:$0xff]  }
 0x172   :  { %1931 = vmatpush1.bf16.msra.mxu0 %v3291_v17  ;;  %1891 = vmatprep.subr.bf16.mxu1 %v3296_v59  ;;  %v3380_v17 = vld [vmem:[#allocation7 + $0x34] ss:$8 sps:$4 sm:$0xff]   ;;  %v3414_v59 = vld [vmem:[#allocation7 + $0x170] ss:$8 sps:$4 sm:$0xff]  }
 0x173   :  { %1932 = vmatprep.subr.bf16.mxu0 %v3299_v60  ;;  %v3416_v60 = vld [vmem:[#allocation7 + $0x174] ss:$8 sps:$4 sm:$0xff]  }
 0x175   :  { %1892 = vmatpush1.bf16.msra.mxu1 %v3294_v61  ;;  %v3419_v61 = vld [vmem:[#allocation7 + $0x164] ss:$8 sps:$4 sm:$0xff]  }
 0x176   :  { %1933 = vmatpush1.bf16.msra.mxu0 %v3297_v62  ;;  %1893 = vmatprep.subr.bf16.mxu1 %v3302_v63  ;;  %v3383_v62 = vld [vmem:[#allocation7 + $0x24] ss:$8 sps:$4 sm:$0xff]   ;;  %v3422_v63 = vld [vmem:[#allocation7 + $0x154] ss:$8 sps:$4 sm:$0xff]  }
 0x177   :  { %1934 = vmatprep.subr.bf16.mxu0 %v3305_v0  ;;  %v3381_v0 = vld [vmem:[#allocation7 + $0x20] ss:$8 sps:$4 sm:$0xff]  }
 0x179   :  { %1894 = vmatpush1.bf16.msra.mxu1 %v3300_v1  ;;  %v3420_v1 = vld [vmem:[#allocation7 + $0x150] ss:$8 sps:$4 sm:$0xff]  }
 0x17a   :  { %1935 = vmatpush1.bf16.msra.mxu0 %v3303_v2  ;;  %1895 = vmatprep.subr.bf16.mxu1 %v3308_v3  ;;  %v3386_v2 = vld [vmem:[#allocation7 + $0x14] ss:$8 sps:$4 sm:$0xff]   ;;  %v3425_v3 = vld [vmem:[#allocation7 + $0x144] ss:$8 sps:$4 sm:$0xff]  }
 0x17b   :  { %1936 = vmatprep.subr.bf16.mxu0 %v3311_v4  ;;  %v3384_v4 = vld [vmem:[#allocation7 + $0x10] ss:$8 sps:$4 sm:$0xff]  }
 0x17d   :  { %1896 = vmatpush1.bf16.msra.mxu1 %v3306_v5  ;;  %v3423_v5 = vld [vmem:[#allocation7 + $0x140] ss:$8 sps:$4 sm:$0xff]  }
 0x17e   :  { %1937 = vmatpush1.bf16.msra.mxu0 %v3309_v6  ;;  %1897 = vmatprep.subr.bf16.mxu1 %v3314_v7  ;;  %v3389_v6 = vld [vmem:[#allocation7 + $0x4] ss:$8 sps:$4 sm:$0xff]   ;;  %v3428_v7 = vld [vmem:[#allocation7 + $0x134] ss:$8 sps:$4 sm:$0xff]  }
 0x17f   :  { %1938 = vmatprep.subr.bf16.mxu0 %v3317_v8  ;;  %v3387_v8 = vld [vmem:[#allocation7] ss:$8 sps:$4 sm:$0xff]  }
 0x181   :  { %1898 = vmatpush1.bf16.msra.mxu1 %v3312_v9  ;;  %v3426_v9 = vld [vmem:[#allocation7 + $0x130] ss:$8 sps:$4 sm:$0xff]  }
 0x182   :  { %1939 = vmatpush1.bf16.msra.mxu0 %v3315_v10  ;;  %1899 = vmatprep.subr.bf16.mxu1 %v3320_v11  ;;  %v3392_v10 = vld [vmem:[#allocation7 + $0xf4] ss:$8 sps:$4 sm:$0xff]   ;;  %v3431_v11 = vld [vmem:[#allocation7 + $0x124] ss:$8 sps:$4 sm:$0xff]  }
 0x183   :  { %1940 = vmatprep.subr.bf16.mxu0 %v3323_v12  ;;  %v3390_v12 = vld [vmem:[#allocation7 + $0xf0] ss:$8 sps:$4 sm:$0xff]  }
 0x185   :  { %1900 = vmatpush2.bf16.msra.mxu1 %v3318_v14  ;;  %v3429_v14 = vld [vmem:[#allocation7 + $0x120] ss:$8 sps:$4 sm:$0xff]  }
 0x186   :  { %1941 = vmatpush2.bf16.msra.mxu0 %v3321_v15  ;;  %1901 = vmatprep.subr.bf16.mxu1 %v3326_v16  ;;  %v3395_v15 = vld [vmem:[#allocation7 + $0xe4] ss:$8 sps:$4 sm:$0xff]   ;;  %v3434_v16 = vld [vmem:[#allocation7 + $0x114] ss:$8 sps:$4 sm:$0xff]  }
 0x187   :  { %1942 = vmatprep.subr.bf16.mxu0 %v3329_v18  ;;  %v3393_v18 = vld [vmem:[#allocation7 + $0xe0] ss:$8 sps:$4 sm:$0xff]  }
 0x189   :  { %1902 = vmatpush2.bf16.msra.mxu1 %v3324_v19  ;;  %v3432_v19 = vld [vmem:[#allocation7 + $0x110] ss:$8 sps:$4 sm:$0xff]  }
 0x18a   :  { %1943 = vmatpush2.bf16.msra.mxu0 %v3327_v21  ;;  %1903 = vmatprep.subr.bf16.mxu1 %v3332_v22  ;;  %v3398_v21 = vld [vmem:[#allocation7 + $0xd4] ss:$8 sps:$4 sm:$0xff]   ;;  %v3437_v22 = vld [vmem:[#allocation7 + $0x104] ss:$8 sps:$4 sm:$0xff]  }
 0x18b   :  { %1944 = vmatprep.subr.bf16.mxu0 %v3335_v23  ;;  %v3396_v23 = vld [vmem:[#allocation7 + $0xd0] ss:$8 sps:$4 sm:$0xff]  }
 0x18d   :  { %1904 = vmatpush2.bf16.msra.mxu1 %v3330_v24  ;;  %v3435_v24 = vld [vmem:[#allocation7 + $0x100] ss:$8 sps:$4 sm:$0xff]  }
 0x18e   :  { %1945 = vmatpush2.bf16.msra.mxu0 %v3333_v25  ;;  %1905 = vmatprep.subr.bf16.mxu1 %v3338_v26  ;;  %v3401_v25 = vld [vmem:[#allocation7 + $0xc4] ss:$8 sps:$4 sm:$0xff]   ;;  %v3440_v26 = vld [vmem:[#allocation7 + $0x1f4] ss:$8 sps:$4 sm:$0xff]  }
 0x18f   :  { %1946 = vmatprep.subr.bf16.mxu0 %v3341_v27  ;;  %v3399_v27 = vld [vmem:[#allocation7 + $0xc0] ss:$8 sps:$4 sm:$0xff]  }
 0x191   :  { %1906 = vmatpush2.bf16.msra.mxu1 %v3336_v28  ;;  %v3438_v28 = vld [vmem:[#allocation7 + $0x1f0] ss:$8 sps:$4 sm:$0xff]  }
 0x192   :  { %1947 = vmatpush2.bf16.msra.mxu0 %v3339_v29  ;;  %1907 = vmatprep.subr.bf16.mxu1 %v3344_v30  ;;  %v3404_v29 = vld [vmem:[#allocation7 + $0xb4] ss:$8 sps:$4 sm:$0xff]   ;;  %v3443_v30 = vld [vmem:[#allocation7 + $0x1e4] ss:$8 sps:$4 sm:$0xff]  }
 0x193   :  { %1948 = vmatprep.subr.bf16.mxu0 %v3347_v31  ;;  %v3402_v31 = vld [vmem:[#allocation7 + $0xb0] ss:$8 sps:$4 sm:$0xff]  }
 0x195   :  { %1908 = vmatpush2.bf16.msra.mxu1 %v3342_v32  ;;  %v3441_v32 = vld [vmem:[#allocation7 + $0x1e0] ss:$8 sps:$4 sm:$0xff]  }
 0x196   :  { %1949 = vmatpush2.bf16.msra.mxu0 %v3345_v33  ;;  %1909 = vmatprep.subr.bf16.mxu1 %v3350_v34  ;;  %v3407_v33 = vld [vmem:[#allocation7 + $0xa4] ss:$8 sps:$4 sm:$0xff]   ;;  %v3446_v34 = vld [vmem:[#allocation7 + $0x1d4] ss:$8 sps:$4 sm:$0xff]  }
 0x197   :  { %1950 = vmatprep.subr.bf16.mxu0 %v3353_v35  ;;  %v3405_v35 = vld [vmem:[#allocation7 + $0xa0] ss:$8 sps:$4 sm:$0xff]  }
 0x199   :  { %1910 = vmatpush2.bf16.msra.mxu1 %v3348_v36  ;;  %v3444_v36 = vld [vmem:[#allocation7 + $0x1d0] ss:$8 sps:$4 sm:$0xff]  }
 0x19a   :  { %1951 = vmatpush2.bf16.msra.mxu0 %v3351_v37  ;;  %1911 = vmatprep.subr.bf16.mxu1 %v3356_v38  ;;  %v3410_v37 = vld [vmem:[#allocation7 + $0x94] ss:$8 sps:$4 sm:$0xff]   ;;  %v3449_v38 = vld [vmem:[#allocation7 + $0x1c4] ss:$8 sps:$4 sm:$0xff]  }
 0x19b   :  { %1952 = vmatprep.subr.bf16.mxu0 %v3359_v56  ;;  %v3408_v56 = vld [vmem:[#allocation7 + $0x90] ss:$8 sps:$4 sm:$0xff]  }
 0x19d   :  { %1912 = vmatpush2.bf16.msra.mxu1 %v3354_v39  ;;  %v3447_v39 = vld [vmem:[#allocation7 + $0x1c0] ss:$8 sps:$4 sm:$0xff]  }
 0x19e   :  { %1953 = vmatpush2.bf16.msra.mxu0 %v3357_v40  ;;  %1913 = vmatprep.subr.bf16.mxu1 %v3362_v42  ;;  %v3413_v40 = vld [vmem:[#allocation7 + $0x84] ss:$8 sps:$4 sm:$0xff]   ;;  %v3452_v42 = vld [vmem:[#allocation7 + $0x1b4] ss:$8 sps:$4 sm:$0xff]  }
 0x19f   :  { %1954 = vmatprep.subr.bf16.mxu0 %v3365_v43  ;;  %v3411_v43 = vld [vmem:[#allocation7 + $0x80] ss:$8 sps:$4 sm:$0xff]  }
 0x1a1   :  { %1914 = vmatpush2.bf16.msra.mxu1 %v3360_v44  ;;  %v3450_v44 = vld [vmem:[#allocation7 + $0x1b0] ss:$8 sps:$4 sm:$0xff]  }
 0x1a2   :  { %1955 = vmatpush2.bf16.msra.mxu0 %v3363_v45  ;;  %2369 = vmatprep.subr.bf16.mxu1 %v3368_v46  ;;  %v3455_v45 = vld [vmem:[#allocation7 + $0x1a4] ss:$8 sps:$4 sm:$0xff]  }
 0x1a3   :  { %2410 = vmatprep.subr.bf16.mxu0 %v3416_v60 }
 0x1a4   :  { %1916 = vmatmul.mubr.bf16.vlgmr.msra.gmra.mxu1 %v3700_v13  ;;  %v3378_v13 = vld [vmem:[#allocation7 + $0x30] ss:$8 sps:$4 sm:$0xff]  }
 0x1a5   :  { %1957 = vmatmul.mubr.bf16.vlgmr.msra.gmra.mxu0 %v3719_v41  ;;  %2370 = vmatpush1.bf16.msra.mxu1 %v3366_v47  ;;  %v3417_v41 = vld [vmem:[#allocation7 + $0x160] ss:$8 sps:$4 sm:$0xff]  }
 0x1a6   :  { %2371 = vmatprep.subr.bf16.mxu1 %v3371_v48  ;;  %2411 = vmatpush1.bf16.msra.mxu0 %v3414_v59  ;;  %v3453_v48 = vld [vmem:[#allocation7 + $0x1a0] ss:$8 sps:$4 sm:$0xff]  }
 0x1a7   :  { %2412 = vmatprep.subr.bf16.mxu0 %v3419_v61  ;;  %v3461_v61 = vld [vmem:[#allocation7 + $0x184] ss:$8 sps:$4 sm:$0xff]  }
 0x1a9   :  { %2372 = vmatpush1.bf16.msra.mxu1 %v3369_v49 }
 0x1aa   :  { %2373 = vmatprep.subr.bf16.mxu1 %v3374_v50  ;;  %2413 = vmatpush1.bf16.msra.mxu0 %v3417_v41  ;;  %v737_v41 = vld [vmem:[%s3751_s4] sm:$0xf] }
 0x1ab   :  { %2414 = vmatprep.subr.bf16.mxu0 %v3422_v63  ;;  %v746_v63 = vrot.slane %v737_v41, %v3687_v57 }
 0x1ad   :  { %2374 = vmatpush1.bf16.msra.mxu1 %v3372_v51  ;;  %v3458_v51 = vld [vmem:[#allocation7 + $0x194] ss:$8 sps:$4 sm:$0xff]  }
 0x1ae   :  { %2375 = vmatprep.subr.bf16.mxu1 %v3377_v20  ;;  %2415 = vmatpush1.bf16.msra.mxu0 %v3420_v1 }
 0x1af   :  { %2416 = vmatprep.subr.bf16.mxu0 %v3425_v3 }
 0x1b1   :  { %2376 = vmatpush1.bf16.msra.mxu1 %v3375_v52 }
 0x1b2   :  { %2377 = vmatprep.subr.bf16.mxu1 %v3380_v17  ;;  %2417 = vmatpush1.bf16.msra.mxu0 %v3423_v5  ;;  %v3456_v17 = vld [vmem:[#allocation7 + $0x190] ss:$8 sps:$4 sm:$0xff]  }
 0x1b3   :  { %2418 = vmatprep.subr.bf16.mxu0 %v3428_v7 }
 0x1b5   :  { %2378 = vmatpush1.bf16.msra.mxu1 %v3378_v13  ;;  %v3459_v13 = vld [vmem:[#allocation7 + $0x180] ss:$8 sps:$4 sm:$0xff]  }
 0x1b6   :  { %2379 = vmatprep.subr.bf16.mxu1 %v3383_v62  ;;  %2419 = vmatpush1.bf16.msra.mxu0 %v3426_v9  ;;  %v742_v62 = vrot.slane %v737_v41, %v3678_v54 }
 0x1b7   :  { %2420 = vmatprep.subr.bf16.mxu0 %v3431_v11 }
 0x1b9   :  { %2380 = vmatpush1.bf16.msra.mxu1 %v3381_v0 }
 0x1ba   :  { %2381 = vmatprep.subr.bf16.mxu1 %v3386_v2  ;;  %2421 = vmatpush1.bf16.msra.mxu0 %v3429_v14 }
 0x1bb   :  { %2422 = vmatprep.subr.bf16.mxu0 %v3434_v16 }
 0x1bd   :  { %2382 = vmatpush1.bf16.msra.mxu1 %v3384_v4 }
 0x1be   :  { %2383 = vmatprep.subr.bf16.mxu1 %v3389_v6  ;;  %2423 = vmatpush1.bf16.msra.mxu0 %v3432_v19 }
 0x1bf   :  { %2424 = vmatprep.subr.bf16.mxu0 %v3437_v22  ;;  %v754_v22 = vrot.slane %v737_v41, %v154_v58  ;;  %v3463_v58 = vld [vmem:[#allocation8 + $0x38] sm:$0xff]  }
 0x1c1   :  { %2384 = vmatpush1.bf16.msra.mxu1 %v3387_v8 }
 0x1c2   :  { %2385 = vmatprep.subr.bf16.mxu1 %v3392_v10  ;;  %2425 = vmatpush1.bf16.msra.mxu0 %v3435_v24 }
 0x1c3   :  { %2426 = vmatprep.subr.bf16.mxu0 %v3440_v26 }
 0x1c5   :  { %2386 = vmatpush2.bf16.msra.mxu1 %v3390_v12 }
 0x1c6   :  { %2387 = vmatprep.subr.bf16.mxu1 %v3395_v15  ;;  %2427 = vmatpush2.bf16.msra.mxu0 %v3438_v28 }
 0x1c7   :  { %2428 = vmatprep.subr.bf16.mxu0 %v3443_v30 }
 0x1c9   :  { %2388 = vmatpush2.bf16.msra.mxu1 %v3393_v18 }
 0x1ca   :  { %2389 = vmatprep.subr.bf16.mxu1 %v3398_v21  ;;  %2429 = vmatpush2.bf16.msra.mxu0 %v3441_v32  ;;  %v750_v21 = vrot.slane %v737_v41, %v150_v55 }
 0x1cb   :  { %2430 = vmatprep.subr.bf16.mxu0 %v3446_v34 }
 0x1cd   :  { %2390 = vmatpush2.bf16.msra.mxu1 %v3396_v23 }
 0x1ce   :  { %2391 = vmatprep.subr.bf16.mxu1 %v3401_v25  ;;  %2431 = vmatpush2.bf16.msra.mxu0 %v3444_v36 }
 0x1cf   :  { %2432 = vmatprep.subr.bf16.mxu0 %v3449_v38 }
 0x1d1   :  { %2392 = vmatpush2.bf16.msra.mxu1 %v3399_v27 }
 0x1d2   :  { %2393 = vmatprep.subr.bf16.mxu1 %v3404_v29  ;;  %2433 = vmatpush2.bf16.msra.mxu0 %v3447_v39  ;;  %v3464_v39 = vld [vmem:[#allocation8 + $0x70] sm:$0xff]  }
 0x1d3   :  { %2434 = vmatprep.subr.bf16.mxu0 %v3452_v42  ;;  %v3466_v42 = vld [vmem:[#allocation8 + $0x68] sm:$0xff]  }
 0x1d5   :  { %2394 = vmatpush2.bf16.msra.mxu1 %v3402_v31 }
 0x1d6   :  { %2395 = vmatprep.subr.bf16.mxu1 %v3407_v33  ;;  %2435 = vmatpush2.bf16.msra.mxu0 %v3450_v44  ;;  %v3468_v44 = vld [vmem:[#allocation8 + $0x60] sm:$0xff]  }
 0x1d7   :  { %2436 = vmatprep.subr.bf16.mxu0 %v3455_v45  ;;  %v3469_v45 = vld [vmem:[#allocation8 + $0x20] sm:$0xff]  }
 0x1d9   :  { %2396 = vmatpush2.bf16.msra.mxu1 %v3405_v35 }
 0x1da   :  { %2397 = vmatprep.subr.bf16.mxu1 %v3410_v37  ;;  %2437 = vmatpush2.bf16.msra.mxu0 %v3453_v48  ;;  %v3472_v48 = vld [vmem:[#allocation8 + $0x50] sm:$0xff]  }
 0x1db   :  { %2438 = vmatprep.subr.bf16.mxu0 %v3458_v51  ;;  %v3475_v51 = vld [vmem:[#allocation8 + $0x8] sm:$0xff]  }
 0x1dd   :  { %2398 = vmatpush2.bf16.msra.mxu1 %v3408_v56 }
 0x1de   :  { %2399 = vmatprep.subr.bf16.mxu1 %v3413_v40  ;;  %2439 = vmatpush2.bf16.msra.mxu0 %v3456_v17  ;;  %v3465_v40 = vld [vmem:[#allocation8 + $0x30] sm:$0xff]  }
 0x1df   :  { %2440 = vmatprep.subr.bf16.mxu0 %v3461_v61 }
 0x1e1   :  { %2400 = vmatpush2.bf16.msra.mxu1 %v3411_v43  ;;  %v3467_v43 = vld [vmem:[#allocation8 + $0x28] sm:$0xff]  }
 0x1e2   :  { %2441 = vmatpush2.bf16.msra.mxu0 %v3459_v13  ;;  %2970 = vmatprep.subr.bf16.mxu1 %v3462_v53  ;;  %v2037_v13 = vld [vmem:[%s3753_s6] sm:$0x3] }
 0x1e3   :  { %v2042_v41 = vrot.slane %v2037_v13, %v3678_v54  ;;  %v2953_v54 = vld [vmem:[%s3755_s8] ss:$0 sm:$0xff] }
 0x1e4   :  { %v1753_v46 = vpop.f32.mrf.mxu1  ;;  %v1794_v47 = vpop.f32.mrf.mxu0 }
 0x1e5   :  { %v1754_v0 = vadd.f32 %v1753_v46, %v742_v62  ;;  %v3470_v46 = vld [vmem:[#allocation8 + $0x58] sm:$0xff]   ;;  %v2046_v62 = vrot.slane %v2037_v13, %v3687_v57 }
 0x1e6   :  { %v1755_v49 = vpop.f32.mrf.mxu1  ;;  %v1796_v50 = vpop.f32.mrf.mxu0 }
 0x1e7   :  { %v1756_v1 = vadd.f32 %v1755_v49, %v746_v63  ;;  %v1795_v2 = vadd.f32 %v1794_v47, %v1754_v0  ;;  %v3471_v47 = vld [vmem:[#allocation8 + $0x18] sm:$0xff]   ;;  %v3473_v49 = vld [vmem:[#allocation8 + $0x10] sm:$0xff]  }
 0x1e8   :  { %v1757_v20 = vpop.f32.mrf.mxu1  ;;  %v1798_v52 = vpop.f32.mrf.mxu0 }
 0x1e9   :  { %v1797_v5 = vadd.f32 %v1796_v50, %v1756_v1  ;;  %v3474_v50 = vld [vmem:[#allocation8 + $0x48] sm:$0xff]   ;;  %v3476_v20 = vld [vmem:[#allocation8 + $0x40] sm:$0xff]  }
 0x1ea   :  { %v1758_v59 = vpop.f32.mrf.mxu1  ;;  %v1799_v60 = vpop.f32.mrf.mxu0  ;;  %v3477_v52 = vld [vmem:[#allocation8] sm:$0xff]  }
 0x224   :  { %v1835_v3 = vpop.f32.mrf.mxu1  ;;  %v1876_v4 = vpop.f32.mrf.mxu0 }
 0x225   :  { %v1836_v6 = vadd.f32 %v1835_v3, %v1795_v2  ;;  %v1877_v23 = vadd.f32 %v1876_v4, %v750_v21 }
 0x226   :  { %v1837_v7 = vpop.f32.mrf.mxu1  ;;  %v1878_v8 = vpop.f32.mrf.mxu0 }
 0x227   :  { %v1838_v9 = vadd.f32 %v1837_v7, %v1797_v5  ;;  %v1965_v10 = vmax.f32 %v1836_v6, 0.0  ;;  %v1879_v25 = vadd.f32 %v1878_v8, %v754_v22 }
 0x228   :  { %v1839_v11 = vpop.f32.mrf.mxu1  ;;  %v1880_v12 = vpop.f32.mrf.mxu0 }
 0x229   :  { %v1966_v14 = vmax.f32 %v1838_v9, 0.0  ;;  %v1969_v19 = vpack.c.bf16 %v1965_v10, %v1965_v10 }
 0x22a   :  { %v1840_v15 = vpop.f32.mrf.mxu1  ;;  %v1881_v16 = vpop.f32.mrf.mxu0 }
 0x22b   :  { %v1970_v18 = vpack.c.bf16 %v1966_v14, %v1966_v14 }
 0x22d   :  { %2401 = vmatprep.mubr.bf16.mxu1 %v1970_v18 }
 0x22e   :  { %2402 = vmatmul.mubr.bf16.vlgmr.msra.gmra.mxu1 %v1969_v19 }
 0x22f   :  { %2971 = vmatpush3.bf16.msra.mxu1 %v3463_v58 }
 0x230   :  { %2972 = vmatprep.subr.bf16.mxu1 %v3464_v39 }
 0x233   :  { %2973 = vmatpush3.bf16.msra.mxu1 %v3465_v40 }
 0x234   :  { %2974 = vmatprep.subr.bf16.mxu1 %v3466_v42 }
 0x237   :  { %2975 = vmatpush3.bf16.msra.mxu1 %v3467_v43 }
 0x238   :  { %2976 = vmatprep.subr.bf16.mxu1 %v3468_v44 }
 0x23b   :  { %2977 = vmatpush3.bf16.msra.mxu1 %v3469_v45 }
 0x23c   :  { %2978 = vmatprep.subr.bf16.mxu1 %v3470_v46 }
 0x23f   :  { %2979 = vmatpush3.bf16.msra.mxu1 %v3471_v47 }
 0x240   :  { %2980 = vmatprep.subr.bf16.mxu1 %v3472_v48 }
 0x243   :  { %2981 = vmatpush3.bf16.msra.mxu1 %v3473_v49 }
 0x244   :  { %2982 = vmatprep.subr.bf16.mxu1 %v3474_v50 }
 0x247   :  { %2983 = vmatpush3.bf16.msra.mxu1 %v3475_v51 }
 0x248   :  { %2984 = vmatprep.subr.bf16.mxu1 %v3476_v20 }
 0x24b   :  { %2985 = vmatpush3.bf16.msra.mxu1 %v3477_v52 }
 0x264   :  { %v1917_v24 = vpop.f32.mrf.mxu1 }
 0x265   :  { %v1918_v26 = vadd.f32 %v1917_v24, %v1877_v23  ;;  %v1958_v27 = vpop.f32.mrf.mxu0 }
 0x266   :  { %v1919_v28 = vpop.f32.mrf.mxu1 }
 0x267   :  { %v1959_v29 = vadd.f32 %v1958_v27, %v1918_v26  ;;  %v1920_v30 = vadd.f32 %v1919_v28, %v1879_v25  ;;  %v1960_v31 = vpop.f32.mrf.mxu0 }
 0x268   :  { %v1921_v32 = vpop.f32.mrf.mxu1 }
 0x269   :  { %v1961_v33 = vadd.f32 %v1960_v31, %v1920_v30  ;;  %v1962_v34 = vpop.f32.mrf.mxu0  ;;  %v1967_v35 = vmax.f32 %v1959_v29, 0.0 }
 0x26a   :  { %v1922_v36 = vpop.f32.mrf.mxu1 }
 0x26b   :  { %v1968_v37 = vmax.f32 %v1961_v33, 0.0  ;;  %v1963_v38 = vpop.f32.mrf.mxu0  ;;  %v1971_v56 = vpack.c.bf16 %v1967_v35, %v1967_v35 }
 0x26d   :  { %v1972_v55 = vpack.c.bf16 %v1968_v37, %v1968_v37 }
 0x26f   :  { %2442 = vmatprep.mubr.bf16.mxu0 %v1972_v55 }
 0x270   :  { %2443 = vmatmul.mubr.bf16.vlgmr.msra.gmra.mxu0 %v1971_v56 }
 0x2ee   :  { %v2403_v17 = vpop.f32.mrf.mxu1 }
 0x2ef   :  { %v2404_v63 = vadd.f32 %v2403_v17, %v2042_v41 }
 0x2f0   :  { %v2405_v59 = vpop.f32.mrf.mxu1 }
 0x2f1   :  { %v2406_v1 = vadd.f32 %v2405_v59, %v2046_v62 }
 0x2f2   :  { %v2407_v60 = vpop.f32.mrf.mxu1 }
 0x2f4   :  { %v2408_v61 = vpop.f32.mrf.mxu1 }
 0x330   :  { %v2444_v0 = vpop.f32.mrf.mxu0 }
 0x331   :  { %v2445_v2 = vadd.f32 %v2444_v0, %v2404_v63 }
 0x332   :  { %v2446_v3 = vpop.f32.mrf.mxu0 }
 0x333   :  { %v2447_v4 = vadd.f32 %v2446_v3, %v2406_v1  ;;  %v2451_v5 = vmax.f32 %v2445_v2, 0.0 }
 0x334   :  { %v2448_v6 = vpop.f32.mrf.mxu0 }
 0x335   :  { %v2452_v7 = vmax.f32 %v2447_v4, 0.0  ;;  %v2453_v10 = vpack.c.bf16 %v2451_v5, %v2451_v5 }
 0x336   :  { %v2449_v8 = vpop.f32.mrf.mxu0 }
 0x337   :  { %v2454_v9 = vpack.c.bf16 %v2452_v7, %v2452_v7 }
 0x339   :  { %2622 = vmatprep.mubr.bf16.mxu1 %v2454_v9 }
 0x33a   :  { %2623 = vmatmul.mubr.bf16.vlgmr.msra.gmra.mxu1 %v2453_v10 }
 0x3fa   :  { %v2986_v11 = vpop.f32.mrf.mxu1 }
 0x3fc   :  { %v2987_v57 = vpop.f32.mrf.mxu1 }
 0x3fd   :  { %v2988_v12 = vadd.f32 %v2987_v57, %v2986_v11 }
 0x3fe   :  { %v2989_v14 = vpop.f32.mrf.mxu1 }
 0x3ff   :  { %v2625_v15 = vadd.f32 %v2988_v12, %v2953_v54 }
 0x400   :  { %v2990_v16 = vpop.f32.mrf.mxu1 }
 0x401   :  { %3478 = vtanh.f32 %v2625_v15 }
 0x40e   :  { %v3479_v18 = vpop.eup %3478 }
 0x40f   :  { %2631 = vst [vmem:[#allocation10] sm:$0xff] %v3479_v18 }
 0x410   :  { %3571 = shalt.err (!%p3568_p10)
}
 0x411   :  { %2641 = dma.vmem_to_hbm [thread:$0]  %s2639_s19, 128, %s3756_s9, [#allocation4]  }
 0x412   :  { %3586 = dma.done.wait [#allocation4], 128  }
 0x413   :  { %3587 = vsyncadd [#allocation4], 4294967168 }
 0x414   :  { %2645 = vsyncpa [#allocation3], 1 }
 0x415   :  { %2646 = vsyncpa [#allocation6], 1 }
 0x416   :  { %2647 = vsyncpa [#allocation9], 1 }
 0x417   :  { %2648 = vsyncpa [#allocation4], 1 }

</bundles_post_ra>
